<compile_context>
chip_gen: v6e
topology: v6e:2x2x1
jax: 0.10.0
libtpu: 0.0.40
codegen_flags: <defaults>
</compile_context>

<pallas_src>
import functools

import jax
import jax.numpy as jnp
from jax import lax
from jax.experimental import pallas as pl
from jax.experimental.pallas import tpu as pltpu


# ----------------------------------------------------------------------------
# Packed-parameter layout (every section starts on a sublane-aligned row).
# ----------------------------------------------------------------------------
def _round_up(n, m=8):
    return ((n + m - 1) // m) * m


def _pack_layout(c_in, c, s):
    tap_stride = _round_up(c_in)
    lay = {"tap": tuple(k * tap_stride for k in range(3))}
    lay["wg"] = 3 * tap_stride
    lay["wvo"] = lay["wg"] + _round_up(c)
    lay["qk"] = lay["wvo"] + _round_up(c)
    lay["bias"] = lay["qk"] + _round_up(s)
    lay["total"] = lay["bias"] + 8          # rows: enc_b, bg, bo (padded to one 8-row tile)
    return lay


def fold_params(params):
    """One-time, param-load-time folding + packing (NOT per forward call).

    qk  = slots @ Wq @ Wk^T   (S, C)
    wvo = Wv @ Wo             (C, C)
    Everything with C columns is packed into a single (P, C) slab -> 1 weight DMA per call.
    """
    enc_w = params["enc_w"]                 # (3, C_in, C)
    _, c_in, c = enc_w.shape
    s = params["slots"].shape[0]
    lay = _pack_layout(c_in, c, s)

    qk = params["slots"] @ params["wq"] @ params["wk"].T
    wvo = params["wv"] @ params["wo"]

    w_all = jnp.zeros((lay["total"], c), jnp.float32)
    for k in range(3):
        w_all = w_all.at[lay["tap"][k]:lay["tap"][k] + c_in, :].set(enc_w[k])
    w_all = w_all.at[lay["wg"]:lay["wg"] + c, :].set(params["wg"])
    w_all = w_all.at[lay["wvo"]:lay["wvo"] + c, :].set(wvo)
    w_all = w_all.at[lay["qk"]:lay["qk"] + s, :].set(qk)
    w_all = w_all.at[lay["bias"] + 0, :].set(params["enc_b"][0])
    w_all = w_all.at[lay["bias"] + 1, :].set(params["bg"][0])
    w_all = w_all.at[lay["bias"] + 2, :].set(params["bo"][0])

    meta = {"c_in": c_in, "c": c, "s": s, "lay": lay}
    return w_all, meta


# ----------------------------------------------------------------------------
# Fused kernel: encoder (causal conv + ReLU) + global branch + local branch.
# One grid step handles the whole batch; only two input DMAs (x, packed weights).
# ----------------------------------------------------------------------------
def slotformer_kernel(x_ref, w_ref, inter_ref, g_ref, l_ref,
                      *, B, L, C, C_IN, S, lay):
    BL = B * L
    x = x_ref[...]                                                     # (B*L, C_in)

    # ---- encoder: causal k=3 conv as 3 shifted-dot accumulations ----
    # tap pairing (stand-in): enc_w[0] <-> x[t], enc_w[1] <-> x[t-1], enc_w[2] <-> x[t-2].
    t = lax.broadcasted_iota(jnp.int32, (BL, C_IN), 0) % L             # position inside each seq
    x1 = jnp.where(t >= 1, pltpu.roll(x, shift=1, axis=0), 0.0)        # x[t-1] (zero at seq start)
    x2 = jnp.where(t >= 2, pltpu.roll(x, shift=2, axis=0), 0.0)        # x[t-2]
    feat = jnp.dot(x, w_ref[lay["tap"][0]:lay["tap"][0] + C_IN, :],
                   preferred_element_type=jnp.float32)
    feat = feat + jnp.dot(x1, w_ref[lay["tap"][1]:lay["tap"][1] + C_IN, :],
                          preferred_element_type=jnp.float32)
    feat = feat + jnp.dot(x2, w_ref[lay["tap"][2]:lay["tap"][2] + C_IN, :],
                          preferred_element_type=jnp.float32)
    bias_blk = w_ref[lay["bias"]:lay["bias"] + 8, :]                   # one aligned (8, C) load
    feat = jnp.maximum(feat + bias_blk[0:1, :], 0.0)                   # + enc_b, ReLU -> (B*L, C)
    inter_ref[...] = feat                                              # intermediate output

    # ---- global branch: block-diagonal pooling matmul (MXU) + Linear ----
    r = lax.broadcasted_iota(jnp.int32, (B, BL), 0)
    cidx = lax.broadcasted_iota(jnp.int32, (B, BL), 1)
    seg_lo = r * L
    pool = jnp.where((cidx >= seg_lo) & (cidx < seg_lo + L),
                     jnp.float32(1.0 / L), jnp.float32(0.0))           # (B, B*L)
    pooled = jnp.dot(pool, feat, preferred_element_type=jnp.float32)   # (B, C) temporal mean
    wg = w_ref[lay["wg"]:lay["wg"] + C, :]
    g_ref[...] = (jnp.dot(pooled, wg, preferred_element_type=jnp.float32)
                  + bias_blk[1:2, :])                                  # (B, C)

    # ---- local branch: slot-attention read-out ----
    qk = w_ref[lay["qk"]:lay["qk"] + S, :]                             # pre-folded slots@Wq@Wk^T
    wvo = w_ref[lay["wvo"]:lay["wvo"] + C, :]                          # pre-folded Wv@Wo
    bo = bias_blk[2:3, :]
    scale = 1.0 / jnp.sqrt(jnp.float32(C))
    # one MXU push for the whole batch; contract last dims (no XLU transpose of feat)
    scores_all = lax.dot_general(qk, feat, (((1,), (1,)), ((), ())),
                                 preferred_element_type=jnp.float32) * scale   # (S, B*L)

    for b in range(B):                                                 # B tiny -> static unroll
        sc = scores_all[:, b * L:(b + 1) * L]                          # lane-aligned slice (S, L)
        m = jnp.max(sc, axis=-1, keepdims=True)
        e = jnp.exp(sc - m)
        attn = e * pl.reciprocal(jnp.sum(e, axis=-1, keepdims=True), approx=True)
        fb = feat[b * L:(b + 1) * L, :]                                # (L, C) VMEM reuse
        ctx = jnp.dot(attn, fb, preferred_element_type=jnp.float32)    # (S, C)
        # direct sliced store (no concatenate); attn@feat@Wv@Wo == ctx @ wvo
        l_ref[b * S:(b + 1) * S, :] = (
            jnp.dot(ctx, wvo, preferred_element_type=jnp.float32) + bo)


# ----------------------------------------------------------------------------
# Full SlotFormerPos.forward (c / s / lay are static, bound outside jit).
# ----------------------------------------------------------------------------
def slotformer_pos_forward(x, w_all, *, c_in, c, s, lay):
    B, L, xc_in = x.shape
    assert xc_in == c_in
    x_flat = x.reshape(B * L, c_in)
    P = w_all.shape[0]

    inter_flat, global_repr, local_flat = pl.pallas_call(
        functools.partial(slotformer_kernel, B=B, L=L, C=c, C_IN=c_in, S=s, lay=lay),
        out_shape=(
            jax.ShapeDtypeStruct((B * L, c), jnp.float32),     # intermediate (flat)
            jax.ShapeDtypeStruct((B, c), jnp.float32),         # global_repr
            jax.ShapeDtypeStruct((B * s, c), jnp.float32),     # local_repr (flat)
        ),
        grid_spec=pltpu.PrefetchScalarGridSpec(
            num_scalar_prefetch=0,
            grid=(1,),                                         # whole batch in one step
            in_specs=[
                pl.BlockSpec((B * L, c_in), lambda i: (0, 0)),   # x (flat)
                pl.BlockSpec((P, c), lambda i: (0, 0)),          # packed parameters
            ],
            out_specs=[
                pl.BlockSpec((B * L, c), lambda i: (0, 0)),
                pl.BlockSpec((B, c), lambda i: (0, 0)),
                pl.BlockSpec((B * s, c), lambda i: (0, 0)),
            ],
        ),
        compiler_params=pltpu.CompilerParams(
            dimension_semantics=("arbitrary",)),
    )(x_flat, w_all)

    intermediate = inter_flat.reshape(B, L, c)
    local_repr = local_flat.reshape(B, s, c)
    return intermediate, global_repr, local_repr


def init_params(key, c_in, c_out, num_slots):
    ks = jax.random.split(key, 8)
    scale = 0.1
    return {
        "enc_w": scale * jax.random.normal(ks[0], (3, c_in, c_out), jnp.float32),
        "enc_b": scale * jax.random.normal(ks[1], (1, c_out), jnp.float32),
        "wg": scale * jax.random.normal(ks[2], (c_out, c_out), jnp.float32),
        "bg": jnp.zeros((1, c_out), jnp.float32),
        "slots": scale * jax.random.normal(ks[3], (num_slots, c_out), jnp.float32),
        "wq": scale * jax.random.normal(ks[4], (c_out, c_out), jnp.float32),
        "wk": scale * jax.random.normal(ks[5], (c_out, c_out), jnp.float32),
        "wv": scale * jax.random.normal(ks[6], (c_out, c_out), jnp.float32),
        "wo": scale * jax.random.normal(ks[7], (c_out, c_out), jnp.float32),
        "bo": jnp.zeros((1, c_out), jnp.float32),
    }


def reference_forward(x, params):
    """Plain-JAX reference of the same stand-in modules (for a tolerance check)."""
    xp = jnp.pad(x, ((0, 0), (2, 0), (0, 0)))
    feat = (jnp.einsum("bli,io->blo", xp[:, 2:, :], params["enc_w"][0])
            + jnp.einsum("bli,io->blo", xp[:, 1:-1, :], params["enc_w"][1])
            + jnp.einsum("bli,io->blo", xp[:, :-2, :], params["enc_w"][2]))
    feat = jax.nn.relu(feat + params["enc_b"][0])
    g = feat.mean(axis=1) @ params["wg"] + params["bg"][0]
    q = params["slots"] @ params["wq"]
    k = jnp.einsum("blc,cd->bld", feat, params["wk"])
    v = jnp.einsum("blc,cd->bld", feat, params["wv"])
    scores = jnp.einsum("sd,bld->bsl", q, k) / jnp.sqrt(jnp.float32(feat.shape[-1]))
    attn = jax.nn.softmax(scores, axis=-1)
    ctx = jnp.einsum("bsl,bld->bsd", attn, v)
    loc = jnp.einsum("bsd,do->bso", ctx, params["wo"]) + params["bo"][0]
    return feat, g, loc


if __name__ == "__main__":
    B, L, C_IN = 2, 128, 4          # batch, ECG length, ECG leads
    C_OUT = 32                      # encoder_args['output_dims']
    NUM_SLOTS = 8                   # local_branch_args['num_slots']

    key = jax.random.PRNGKey(0)
    k_x, k_p = jax.random.split(key)
    x = jax.random.normal(k_x, (B, L, C_IN), jnp.float32)   # layout: (B, L, C_in)
    params = init_params(k_p, C_IN, C_OUT, NUM_SLOTS)

    # Param-load-time folding/packing (runs once, outside the jitted forward).
    w_all, meta = fold_params(params)
    forward = jax.jit(functools.partial(slotformer_pos_forward, **meta))

    intermediate, global_repr, local_repr = forward(x, w_all)
    jax.block_until_ready((intermediate, global_repr, local_repr))

    assert intermediate.shape == (B, L, C_OUT)
    assert global_repr.shape == (B, C_OUT)
    assert local_repr.shape == (B, NUM_SLOTS, C_OUT)

    # Tolerance check vs plain-JAX reference (approx reciprocal + folded matmuls -> ~1e-3 rel).
    ref_i, ref_g, ref_l = reference_forward(x, params)
    ok = (jnp.allclose(intermediate, ref_i, atol=2e-3, rtol=2e-2)
          and jnp.allclose(global_repr, ref_g, atol=2e-3, rtol=2e-2)
          and jnp.allclose(local_repr, ref_l, atol=2e-3, rtol=2e-2))
    assert bool(ok), "Pallas kernel does not match plain-JAX reference"

    print("KERNEL_OK")
</pallas_src>

<mosaic_0001>
module attributes {stable_mosaic.version = 11 : i64} {
  func.func @slotformer_kernel(%arg0: i32, %arg1: memref<256x4xf32, #tpu.memory_space<vmem>>, %arg2: memref<104x32xf32, #tpu.memory_space<vmem>>, %arg3: memref<256x32xf32, #tpu.memory_space<vmem>>, %arg4: memref<2x32xf32, #tpu.memory_space<vmem>>, %arg5: memref<16x32xf32, #tpu.memory_space<vmem>>) attributes {dimension_semantics = [#tpu.dimension_semantics<arbitrary>], iteration_bounds = array<i64: 1>, scalar_prefetch = 0 : i64, scratch_operands = 0 : i64, tpu.core_type = #tpu.core_type<tc>, window_params = [{pipeline_mode = #tpu.pipeline_mode<synchronous>, transform_indices = @transform_0, window_bounds = array<i64: 256, 4>}, {pipeline_mode = #tpu.pipeline_mode<synchronous>, transform_indices = @transform_1, window_bounds = array<i64: 104, 32>}, {pipeline_mode = #tpu.pipeline_mode<synchronous>, transform_indices = @transform_2, window_bounds = array<i64: 256, 32>}, {pipeline_mode = #tpu.pipeline_mode<synchronous>, transform_indices = @transform_3, window_bounds = array<i64: 2, 32>}, {pipeline_mode = #tpu.pipeline_mode<synchronous>, transform_indices = @transform_4, window_bounds = array<i64: 16, 32>}]} {
    %c0 = arith.constant 0 : index
    %c0_0 = arith.constant 0 : index
    %0 = vector.load %arg1[%c0, %c0_0] : memref<256x4xf32, #tpu.memory_space<vmem>>, vector<256x4xf32>
    %1 = tpu.iota {dimensions = array<i32: 0>} : vector<256x4xi32>
    %c128_i32 = arith.constant 128 : i32
    %c0_i32 = arith.constant 0 : i32
    %2 = arith.cmpi eq, %c128_i32, %c0_i32 : i32
    %c1_i32 = arith.constant 1 : i32
    %3 = arith.select %2, %c1_i32, %c128_i32 : i32
    %4 = vector.broadcast %3 : i32 to vector<256x4xi32>
    %5 = arith.remsi %1, %4 : vector<256x4xi32>
    %c0_i32_1 = arith.constant 0 : i32
    %6 = vector.broadcast %c0_i32_1 : i32 to vector<256x4xi32>
    %7 = arith.cmpi ne, %5, %6 : vector<256x4xi32>
    %c0_i32_2 = arith.constant 0 : i32
    %8 = vector.broadcast %c0_i32_2 : i32 to vector<256x4xi32>
    %9 = arith.cmpi slt, %5, %8 : vector<256x4xi32>
    %c0_i32_3 = arith.constant 0 : i32
    %10 = arith.cmpi slt, %3, %c0_i32_3 : i32
    %11 = vector.broadcast %10 : i1 to vector<256x4xi1>
    %12 = vector.broadcast %11 : vector<256x4xi1> to vector<256x4xi1>
    %13 = arith.xori %9, %12 : vector<256x4xi1>
    %14 = arith.andi %13, %7 : vector<256x4xi1>
    %15 = vector.broadcast %3 : i32 to vector<256x4xi32>
    %16 = arith.addi %5, %15 : vector<256x4xi32>
    %17 = arith.select %14, %16, %5 : vector<256x4xi1>, vector<256x4xi32>
    %c1_i32_4 = arith.constant 1 : i32
    %18 = vector.broadcast %c1_i32_4 : i32 to vector<256x4xi32>
    %19 = arith.cmpi sge, %17, %18 : vector<256x4xi32>
    %c1_i32_5 = arith.constant 1 : i32
    %20 = tpu.dynamic_rotate %0 by %c1_i32_5 dim 0 : vector<256x4xf32>, i32 -> vector<256x4xf32>
    %cst = arith.constant 0.000000e+00 : f32
    %21 = vector.broadcast %cst : f32 to vector<256x4xf32>
    %22 = arith.select %19, %20, %21 : vector<256x4xi1>, vector<256x4xf32>
    %c2_i32 = arith.constant 2 : i32
    %23 = vector.broadcast %c2_i32 : i32 to vector<256x4xi32>
    %24 = arith.cmpi sge, %17, %23 : vector<256x4xi32>
    %c2_i32_6 = arith.constant 2 : i32
    %25 = tpu.dynamic_rotate %0 by %c2_i32_6 dim 0 : vector<256x4xf32>, i32 -> vector<256x4xf32>
    %cst_7 = arith.constant 0.000000e+00 : f32
    %26 = vector.broadcast %cst_7 : f32 to vector<256x4xf32>
    %27 = arith.select %24, %25, %26 : vector<256x4xi1>, vector<256x4xf32>
    %c0_8 = arith.constant 0 : index
    %c0_9 = arith.constant 0 : index
    %28 = vector.load %arg2[%c0_8, %c0_9] : memref<104x32xf32, #tpu.memory_space<vmem>>, vector<4x32xf32>
    %cst_10 = arith.constant dense<0.000000e+00> : vector<256x32xf32>
    %29 = tpu.matmul %0, %28, %cst_10 {dimension_numbers = #tpu.dot_dimension_numbers<[1], [0], [0], [1], [0, 0, 1, 1], [], []>} : vector<256x4xf32>, vector<4x32xf32>, vector<256x32xf32> -> vector<256x32xf32>
    %c8 = arith.constant 8 : index
    %c0_11 = arith.constant 0 : index
    %30 = vector.load %arg2[%c8, %c0_11] : memref<104x32xf32, #tpu.memory_space<vmem>>, vector<4x32xf32>
    %cst_12 = arith.constant dense<0.000000e+00> : vector<256x32xf32>
    %31 = tpu.matmul %22, %30, %cst_12 {dimension_numbers = #tpu.dot_dimension_numbers<[1], [0], [0], [1], [0, 0, 1, 1], [], []>} : vector<256x4xf32>, vector<4x32xf32>, vector<256x32xf32> -> vector<256x32xf32>
    %32 = arith.addf %29, %31 : vector<256x32xf32>
    %c16 = arith.constant 16 : index
    %c0_13 = arith.constant 0 : index
    %33 = vector.load %arg2[%c16, %c0_13] : memref<104x32xf32, #tpu.memory_space<vmem>>, vector<4x32xf32>
    %cst_14 = arith.constant dense<0.000000e+00> : vector<256x32xf32>
    %34 = tpu.matmul %27, %33, %cst_14 {dimension_numbers = #tpu.dot_dimension_numbers<[1], [0], [0], [1], [0, 0, 1, 1], [], []>} : vector<256x4xf32>, vector<4x32xf32>, vector<256x32xf32> -> vector<256x32xf32>
    %35 = arith.addf %32, %34 : vector<256x32xf32>
    %c96 = arith.constant 96 : index
    %c0_15 = arith.constant 0 : index
    %36 = vector.load %arg2[%c96, %c0_15] : memref<104x32xf32, #tpu.memory_space<vmem>>, vector<8x32xf32>
    %37 = vector.extract_strided_slice %36 {offsets = [0, 0], sizes = [1, 32], strides = [1, 1]} : vector<8x32xf32> to vector<1x32xf32>
    %38 = vector.broadcast %37 : vector<1x32xf32> to vector<256x32xf32>
    %39 = arith.addf %35, %38 : vector<256x32xf32>
    %cst_16 = arith.constant 0.000000e+00 : f32
    %40 = vector.broadcast %cst_16 : f32 to vector<256x32xf32>
    %41 = arith.maximumf %39, %40 : vector<256x32xf32>
    %c0_17 = arith.constant 0 : index
    %c0_18 = arith.constant 0 : index
    %42 = vector.load %arg3[%c0_17, %c0_18] : memref<256x32xf32, #tpu.memory_space<vmem>>, vector<256x32xf32>
    tpu.vector_store %arg3[%c0_17, %c0_18], %41 {strides = array<i32>} : memref<256x32xf32, #tpu.memory_space<vmem>>, vector<256x32xf32>,
    %43 = tpu.iota {dimensions = array<i32: 0>} : vector<2x256xi32>
    %44 = tpu.iota {dimensions = array<i32: 1>} : vector<2x256xi32>
    %c128_i32_19 = arith.constant 128 : i32
    %45 = vector.broadcast %c128_i32_19 : i32 to vector<2x256xi32>
    %46 = arith.muli %43, %45 : vector<2x256xi32>
    %47 = arith.cmpi sge, %44, %46 : vector<2x256xi32>
    %c128_i32_20 = arith.constant 128 : i32
    %48 = vector.broadcast %c128_i32_20 : i32 to vector<2x256xi32>
    %49 = arith.addi %46, %48 : vector<2x256xi32>
    %50 = arith.cmpi slt, %44, %49 : vector<2x256xi32>
    %51 = arith.andi %47, %50 : vector<2x256xi1>
    %cst_21 = arith.constant 7.812500e-03 : f32
    %cst_22 = arith.constant 0.000000e+00 : f32
    %52 = vector.broadcast %cst_21 : f32 to vector<2x256xf32>
    %53 = vector.broadcast %cst_22 : f32 to vector<2x256xf32>
    %54 = arith.select %51, %52, %53 : vector<2x256xi1>, vector<2x256xf32>
    %cst_23 = arith.constant dense<0.000000e+00> : vector<2x32xf32>
    %55 = tpu.matmul %54, %41, %cst_23 {dimension_numbers = #tpu.dot_dimension_numbers<[1], [0], [0], [1], [0, 0, 1, 1], [], []>} : vector<2x256xf32>, vector<256x32xf32>, vector<2x32xf32> -> vector<2x32xf32>
    %c24 = arith.constant 24 : index
    %c0_24 = arith.constant 0 : index
    %56 = vector.load %arg2[%c24, %c0_24] : memref<104x32xf32, #tpu.memory_space<vmem>>, vector<32x32xf32>
    %cst_25 = arith.constant dense<0.000000e+00> : vector<2x32xf32>
    %57 = tpu.matmul %55, %56, %cst_25 {dimension_numbers = #tpu.dot_dimension_numbers<[1], [0], [0], [1], [0, 0, 1, 1], [], []>} : vector<2x32xf32>, vector<32x32xf32>, vector<2x32xf32> -> vector<2x32xf32>
    %58 = vector.extract_strided_slice %36 {offsets = [1, 0], sizes = [1, 32], strides = [1, 1]} : vector<8x32xf32> to vector<1x32xf32>
    %59 = vector.broadcast %58 : vector<1x32xf32> to vector<2x32xf32>
    %60 = arith.addf %57, %59 : vector<2x32xf32>
    %c0_26 = arith.constant 0 : index
    %c0_27 = arith.constant 0 : index
    %61 = vector.load %arg4[%c0_26, %c0_27] : memref<2x32xf32, #tpu.memory_space<vmem>>, vector<2x32xf32>
    tpu.vector_store %arg4[%c0_26, %c0_27], %60 {strides = array<i32>} : memref<2x32xf32, #tpu.memory_space<vmem>>, vector<2x32xf32>,
    %c88 = arith.constant 88 : index
    %c0_28 = arith.constant 0 : index
    %62 = vector.load %arg2[%c88, %c0_28] : memref<104x32xf32, #tpu.memory_space<vmem>>, vector<8x32xf32>
    %c56 = arith.constant 56 : index
    %c0_29 = arith.constant 0 : index
    %63 = vector.load %arg2[%c56, %c0_29] : memref<104x32xf32, #tpu.memory_space<vmem>>, vector<32x32xf32>
    %64 = vector.extract_strided_slice %36 {offsets = [2, 0], sizes = [1, 32], strides = [1, 1]} : vector<8x32xf32> to vector<1x32xf32>
    %cst_30 = arith.constant 3.200000e+01 : f32
    %65 = math.sqrt %cst_30 : f32
    %cst_31 = arith.constant 1.000000e+00 : f32
    %66 = arith.divf %cst_31, %65 : f32
    %cst_32 = arith.constant dense<0.000000e+00> : vector<8x256xf32>
    %67 = tpu.matmul %62, %41, %cst_32 {dimension_numbers = #tpu.dot_dimension_numbers<[1], [1], [0], [0], [0, 0, 1, 0], [], []>} : vector<8x32xf32>, vector<256x32xf32>, vector<8x256xf32> -> vector<8x256xf32>
    %68 = vector.broadcast %66 : f32 to vector<8x256xf32>
    %69 = arith.mulf %67, %68 : vector<8x256xf32>
    %70 = vector.extract_strided_slice %69 {offsets = [0, 0], sizes = [8, 128], strides = [1, 1]} : vector<8x256xf32> to vector<8x128xf32>
    %cst_33 = arith.constant dense<0xFF800000> : vector<8xf32>
    %71 = vector.multi_reduction <maximumf>, %70, %cst_33 [1] : vector<8x128xf32> to vector<8xf32>
    %72 = vector.shape_cast %71 : vector<8xf32> to vector<8x1xf32>
    %73 = vector.broadcast %72 : vector<8x1xf32> to vector<8x128xf32>
    %74 = arith.subf %70, %73 : vector<8x128xf32>
    %75 = math.exp %74 : vector<8x128xf32>
    %cst_34 = arith.constant dense<0.000000e+00> : vector<8xf32>
    %76 = vector.multi_reduction <add>, %75, %cst_34 [1] : vector<8x128xf32> to vector<8xf32>
    %77 = vector.shape_cast %76 : vector<8xf32> to vector<8x1xf32>
    %78 = tpu.reciprocal %77 {approx = true} : vector<8x1xf32> -> vector<8x1xf32>
    %79 = vector.broadcast %78 : vector<8x1xf32> to vector<8x128xf32>
    %80 = arith.mulf %75, %79 : vector<8x128xf32>
    %81 = vector.extract_strided_slice %41 {offsets = [0, 0], sizes = [128, 32], strides = [1, 1]} : vector<256x32xf32> to vector<128x32xf32>
    %cst_35 = arith.constant dense<0.000000e+00> : vector<8x32xf32>
    %82 = tpu.matmul %80, %81, %cst_35 {dimension_numbers = #tpu.dot_dimension_numbers<[1], [0], [0], [1], [0, 0, 1, 1], [], []>} : vector<8x128xf32>, vector<128x32xf32>, vector<8x32xf32> -> vector<8x32xf32>
    %cst_36 = arith.constant dense<0.000000e+00> : vector<8x32xf32>
    %83 = tpu.matmul %82, %63, %cst_36 {dimension_numbers = #tpu.dot_dimension_numbers<[1], [0], [0], [1], [0, 0, 1, 1], [], []>} : vector<8x32xf32>, vector<32x32xf32>, vector<8x32xf32> -> vector<8x32xf32>
    %84 = vector.broadcast %64 : vector<1x32xf32> to vector<8x32xf32>
    %85 = arith.addf %83, %84 : vector<8x32xf32>
    %c0_37 = arith.constant 0 : index
    %c0_38 = arith.constant 0 : index
    %86 = vector.load %arg5[%c0_37, %c0_38] : memref<16x32xf32, #tpu.memory_space<vmem>>, vector<8x32xf32>
    tpu.vector_store %arg5[%c0_37, %c0_38], %85 {strides = array<i32>} : memref<16x32xf32, #tpu.memory_space<vmem>>, vector<8x32xf32>,
    %87 = vector.extract_strided_slice %69 {offsets = [0, 128], sizes = [8, 128], strides = [1, 1]} : vector<8x256xf32> to vector<8x128xf32>
    %cst_39 = arith.constant dense<0xFF800000> : vector<8xf32>
    %88 = vector.multi_reduction <maximumf>, %87, %cst_39 [1] : vector<8x128xf32> to vector<8xf32>
    %89 = vector.shape_cast %88 : vector<8xf32> to vector<8x1xf32>
    %90 = vector.broadcast %89 : vector<8x1xf32> to vector<8x128xf32>
    %91 = arith.subf %87, %90 : vector<8x128xf32>
    %92 = math.exp %91 : vector<8x128xf32>
    %cst_40 = arith.constant dense<0.000000e+00> : vector<8xf32>
    %93 = vector.multi_reduction <add>, %92, %cst_40 [1] : vector<8x128xf32> to vector<8xf32>
    %94 = vector.shape_cast %93 : vector<8xf32> to vector<8x1xf32>
    %95 = tpu.reciprocal %94 {approx = true} : vector<8x1xf32> -> vector<8x1xf32>
    %96 = vector.broadcast %95 : vector<8x1xf32> to vector<8x128xf32>
    %97 = arith.mulf %92, %96 : vector<8x128xf32>
    %98 = vector.extract_strided_slice %41 {offsets = [128, 0], sizes = [128, 32], strides = [1, 1]} : vector<256x32xf32> to vector<128x32xf32>
    %cst_41 = arith.constant dense<0.000000e+00> : vector<8x32xf32>
    %99 = tpu.matmul %97, %98, %cst_41 {dimension_numbers = #tpu.dot_dimension_numbers<[1], [0], [0], [1], [0, 0, 1, 1], [], []>} : vector<8x128xf32>, vector<128x32xf32>, vector<8x32xf32> -> vector<8x32xf32>
    %cst_42 = arith.constant dense<0.000000e+00> : vector<8x32xf32>
    %100 = tpu.matmul %99, %63, %cst_42 {dimension_numbers = #tpu.dot_dimension_numbers<[1], [0], [0], [1], [0, 0, 1, 1], [], []>} : vector<8x32xf32>, vector<32x32xf32>, vector<8x32xf32> -> vector<8x32xf32>
    %101 = vector.broadcast %64 : vector<1x32xf32> to vector<8x32xf32>
    %102 = arith.addf %100, %101 : vector<8x32xf32>
    %c8_43 = arith.constant 8 : index
    %c0_44 = arith.constant 0 : index
    %103 = vector.load %arg5[%c8_43, %c0_44] : memref<16x32xf32, #tpu.memory_space<vmem>>, vector<8x32xf32>
    tpu.vector_store %arg5[%c8_43, %c0_44], %102 {strides = array<i32>} : memref<16x32xf32, #tpu.memory_space<vmem>>, vector<8x32xf32>,
    return
  }
  func.func @transform_0(%arg0: i32) -> (i32, i32) {
    %c0_i32 = arith.constant 0 : i32
    %c0_i32_0 = arith.constant 0 : i32
    %c0_i32_1 = arith.constant 0 : i32
    return %c0_i32, %c0_i32_0 : i32, i32
  }
  func.func @transform_1(%arg0: i32) -> (i32, i32) {
    %c0_i32 = arith.constant 0 : i32
    %c0_i32_0 = arith.constant 0 : i32
    %c0_i32_1 = arith.constant 0 : i32
    return %c0_i32, %c0_i32_0 : i32, i32
  }
  func.func @transform_2(%arg0: i32) -> (i32, i32) {
    %c0_i32 = arith.constant 0 : i32
    %c0_i32_0 = arith.constant 0 : i32
    %c0_i32_1 = arith.constant 0 : i32
    return %c0_i32, %c0_i32_0 : i32, i32
  }
  func.func @transform_3(%arg0: i32) -> (i32, i32) {
    %c0_i32 = arith.constant 0 : i32
    %c0_i32_0 = arith.constant 0 : i32
    %c0_i32_1 = arith.constant 0 : i32
    return %c0_i32, %c0_i32_0 : i32, i32
  }
  func.func @transform_4(%arg0: i32) -> (i32, i32) {
    %c0_i32 = arith.constant 0 : i32
    %c0_i32_0 = arith.constant 0 : i32
    %c0_i32_1 = arith.constant 0 : i32
    return %c0_i32, %c0_i32_0 : i32, i32
  }
}

</mosaic_0001>

<bundles_post_ra>
// kernel: slotformer_pos_forward.1
= control target key start
LH: loop header
LB: loop body
LE: loop exit
PB: predicated region body
PF: predicated region fallthrough
CT: control target
= control target key end

     0   :  { %10 = vsyncpa [#allocation3], 0  ;;  %vm822_vm0 = vcmask 1043456   ;;  %v4573_v3 = vlaneseq  ;;  %vm725_vm1 = vcmask 31744   ;;  %s4568_s0 = inlined_call_operand.vmem [shape: f32[256,4], index: 0, kind: input, shape index: {}]   ;;  %s4569_s1 = inlined_call_operand.vmem [shape: f32[104,32], index: 1, kind: input, shape index: {}]   ;;  %s4570_s2 = inlined_call_operand.vmem [shape: f32[256,32], index: 2, kind: output, shape index: {0}]   ;;  %s4571_s3 = inlined_call_operand.hbm [shape: f32[2,32], index: 3, kind: output, shape index: {1}]   ;;  %s4572_s4 = inlined_call_operand.hbm [shape: f32[16,32], index: 4, kind: output, shape index: {2}]  }
   0x1   :  { %v724_v0 = vld [vmem:[%s4569_s1 + $0x8] sm:$0xf]  ;;  %v3227_v1 = vld [vmem:[%s4568_s0] sm:$0xff]  ;;  %v3232_v2 = vld [vmem:[%s4568_s0 + $0xf8] sm:$0xff] }
   0x2   :  { %2875 = vmatprep.subr.msk.mxu0 %vm822_vm0, %v724_v0  ;;  %v497_v4 = vrot.slane %v3227_v1, 7  ;;  %v4576_v5 = vrot.slane %v3232_v2, 7  ;;  %v3240_v6 = vld [vmem:[%s4568_s0 + $0x8] sm:$0xff]  ;;  %v723_v7 = vld [vmem:[%s4569_s1] sm:$0xf]  ;;  %v3247_v8 = vshrl.u32 %v4573_v3, 7 }
   0x3   :  { %2876 = vmatpush3.msk.msra.mxu0 %vm822_vm0, %v724_v0  ;;  %v498_v9 = vrot.slane %v3240_v6, 7  ;;  %3128 = vmatprep.subr.msk.mxu1 %vm822_vm0, %v723_v7  ;;  %v3254_v10 = vld [vmem:[%s4568_s0 + $0x10] sm:$0xff]  ;;  %v3262_v12 = vld [vmem:[%s4568_s0 + $0x18] sm:$0xff]  ;;  %v3271_v14 = vld [vmem:[%s4568_s0 + $0x20] sm:$0xff] }
   0x4   :  { %2925 = vmatprep.subr.msk.mxu0 %vm822_vm0, %v723_v7  ;;  %v499_v11 = vrot.slane %v3254_v10, 7  ;;  %3129 = vmatpush3.msk.msra.mxu1 %vm822_vm0, %v723_v7  ;;  %v85_v13 = vand.u32 127, %v3247_v8  ;;  %vm529_vm2 = vcmp.lt.s32.totalorder %v3247_v8, 1  ;;  %v500_v17 = vrot.slane %v3262_v12, 7  ;;  %v3292_v21 = vld [vmem:[%s4568_s0 + $0x28] sm:$0xff]  ;;  %v3298_v22 = vld [vmem:[%s4568_s0 + $0x30] sm:$0xff] }
   0x5   :  { %2930 = vmatprep.mubr.msk.f32.mxu1 %vm725_vm1, %v3254_v10  ;;  %v561_v15 = vsel %vm529_vm2, %v4576_v5, %v497_v4  ;;  %v560_v16 = vsel %vm529_vm2, %v497_v4, %v498_v9  ;;  %v501_v20 = vrot.slane %v3271_v14, 7  ;;  %v502_v24 = vrot.slane %v3292_v21, 7  ;;  %v3311_v25 = vld [vmem:[%s4568_s0 + $0x38] sm:$0xff]  ;;  %v3321_v28 = vld [vmem:[%s4568_s0 + $0x40] sm:$0xff]  ;;  %v3326_v29 = vld [vmem:[%s4568_s0 + $0x48] sm:$0xff] }
   0x6   :  { %2931 = vmatmul.mubr.msk.f32.vlgmr.msra.gmra.mxu1 %vm725_vm1, %v3262_v12  ;;  %vm465_vm3 = vcmp.ge.s32.totalorder %v85_v13, 1  ;;  %v559_v19 = vsel %vm529_vm2, %v498_v9, %v499_v11  ;;  %v558_v23 = vsel %vm529_vm2, %v499_v11, %v500_v17  ;;  %v503_v27 = vrot.slane %v3298_v22, 7  ;;  %v3331_v30 = vld [vmem:[%s4568_s0 + $0x50] sm:$0xff]  ;;  %v3336_v31 = vld [vmem:[%s4568_s0 + $0x58] sm:$0xff]  ;;  %v3341_v32 = vld [vmem:[%s4568_s0 + $0x60] sm:$0xff] }
   0x7   :  { %2933 = vmatprep.mubr.msk.f32.mxu1 %vm725_vm1, %v3271_v14  ;;  %v562_v18 = vsel %vm465_vm3, %v561_v15, 0.0  ;;  %v557_v26 = vsel %vm529_vm2, %v500_v17, %v501_v20  ;;  %v3346_v33 = vld [vmem:[%s4569_s1 + $0x10] sm:$0xf]  ;;  %v3354_v34 = vld [vmem:[%s4568_s0 + $0x68] sm:$0xff]  ;;  %v3357_v35 = vadd.s32 128, %v3247_v8 }
   0x8   :  { %2877 = vmatprep.mubr.msk.f32.mxu0 %vm725_vm1, %v562_v18 }
   0x9   :  { %2878 = vmatmul.mubr.msk.f32.vlgmr.msra.gmra.mxu0 %vm725_vm1, %v560_v16 }
   0xa   :  { %2934 = vmatmul.mubr.msk.f32.gmra.mxu1 %vm725_vm1, %v3292_v21  ;;  %2926 = vmatpush3.msk.msra.mxu0 %vm822_vm0, %v723_v7 }
   0xb   :  { %2880 = vmatprep.mubr.msk.f32.mxu0 %vm725_vm1, %v559_v19  ;;  %2936 = vmatprep.mubr.msk.f32.mxu1 %vm725_vm1, %v3298_v22 }
   0xd   :  { %2881 = vmatmul.mubr.msk.f32.gmra.mxu0 %vm725_vm1, %v558_v23 }
   0xe   :  { %2937 = vmatmul.mubr.msk.f32.gmra.mxu1 %vm725_vm1, %v3311_v25 }
   0xf   :  { %11 = vsyncpa [#allocation5], 0  ;;  %2883 = vmatprep.mubr.msk.f32.mxu0 %vm725_vm1, %v557_v26  ;;  %v556_v36 = vsel %vm529_vm2, %v501_v20, %v502_v24  ;;  %v504_v37 = vrot.slane %v3311_v25, 7  ;;  %v505_v38 = vrot.slane %v3321_v28, 7  ;;  %2939 = vmatprep.mubr.msk.f32.mxu1 %vm725_vm1, %v3321_v28  ;;  %v506_v39 = vrot.slane %v3326_v29, 7  ;;  %v3370_v40 = vld [vmem:[%s4568_s0 + $0x70] sm:$0xff] }
  0x10   :  { %v3375_v41 = vld [vmem:[%s4568_s0 + $0x80] sm:$0xff]  ;;  %v555_v42 = vsel %vm529_vm2, %v502_v24, %v503_v27  ;;  %v507_v43 = vrot.slane %v3331_v30, 7  ;;  %v508_v44 = vrot.slane %v3336_v31, 7  ;;  %v509_v45 = vrot.slane %v3341_v32, 7  ;;  %2975 = vmatprep.subr.msk.mxu0 %vm822_vm0, %v3346_v33  ;;  %v3388_v47 = vld [vmem:[%s4568_s0 + $0x78] sm:$0xff]  ;;  %v3399_v51 = vld [vmem:[%s4568_s0 + $0x88] sm:$0xff] }
  0x11   :  { %v510_v46 = vrot.slane %v3354_v34, 7  ;;  %2884 = vmatmul.mubr.msk.f32.gmra.mxu0 %vm725_vm1, %v556_v36  ;;  %v511_v48 = vrot.slane %v3370_v40, 7  ;;  %v197_v49 = vand.u32 127, %v3357_v35  ;;  %v513_v50 = vrot.slane %v3375_v41, 7  ;;  %v3415_v56 = vld [vmem:[%s4568_s0 + $0x90] sm:$0xff]  ;;  %v3573_v35 = vld [vmem:[%s4568_s0 + $0xa8] sm:$0xff] }
  0x12   :  { %2940 = vmatmul.mubr.msk.f32.gmra.mxu1 %vm725_vm1, %v3326_v29  ;;  %v4575_v52 = vrot.slane %v3227_v1, 6  ;;  %vm658_vm4 = vcmp.lt.s32.totalorder %v3247_v8, 2  ;;  %2886 = vmatprep.mubr.msk.f32.mxu0 %vm725_vm1, %v555_v42  ;;  %v554_v53 = vsel %vm529_vm2, %v503_v27, %v504_v37  ;;  %v553_v54 = vsel %vm529_vm2, %v504_v37, %v505_v38 }
  0x13   :  { %v552_v55 = vsel %vm529_vm2, %v505_v38, %v506_v39  ;;  %2942 = vmatprep.mubr.msk.f32.mxu1 %vm725_vm1, %v3331_v30  ;;  %v551_v57 = vsel %vm529_vm2, %v506_v39, %v507_v43  ;;  %v550_v58 = vsel %vm529_vm2, %v507_v43, %v508_v44  ;;  %v549_v59 = vsel %vm529_vm2, %v508_v44, %v509_v45 }
  0x14   :  { %v512_v60 = vrot.slane %v3388_v47, 7  ;;  %v3426_v61 = vsel %vm529_vm2, %v509_v45, %v510_v46  ;;  %v514_v62 = vrot.slane %v3399_v51, 7  ;;  %vm3431_vm5 = vcmp.ge.s32.totalorder %v85_v13, 2 }
  0x15   :  { %v657_v0 = vrot.slane %v3232_v2, 6  ;;  %2887 = vmatmul.mubr.msk.f32.gmra.mxu0 %vm725_vm1, %v554_v53  ;;  %v3441_v4 = vsel %vm529_vm2, %v510_v46, %v511_v48  ;;  %vm3445_vm6 = vcmp.ge.s32.totalorder %v197_v49, 1  ;;  %v4574_v15 = vrot.slane %v3254_v10, 6 }
  0x16   :  { %2943 = vmatmul.mubr.msk.f32.gmra.mxu1 %vm725_vm1, %v3336_v31  ;;  %v3453_v9 = vsel %vm529_vm2, %v512_v60, %v513_v50  ;;  %2889 = vmatprep.mubr.msk.f32.mxu0 %vm725_vm1, %v553_v54  ;;  %v629_v16 = vrot.slane %v3262_v12, 6  ;;  %v630_v17 = vrot.slane %v3271_v14, 6  ;;  %v3472_v18 = vsel %vm529_vm2, %v511_v48, %v512_v60  ;;  %v3568_v48 = vld [vmem:[%s4568_s0 + $0xa0] sm:$0xff] }
  0x17   :  { %2945 = vmatprep.mubr.msk.f32.mxu1 %vm725_vm1, %v3341_v32  ;;  %v3465_v13 = vsel %vm658_vm4, %v657_v0, %v4575_v52  ;;  %v631_v20 = vrot.slane %v3292_v21, 6  ;;  %v632_v23 = vrot.slane %v3298_v22, 6  ;;  %v578_v24 = vsel %vm3445_vm6, %v3453_v9, 0.0 }
  0x18   :  { %v3486_v12 = vsel %vm658_vm4, %v4574_v15, %v629_v16  ;;  %v3490_v14 = vsel %vm658_vm4, %v629_v16, %v630_v17  ;;  %v633_v26 = vrot.slane %v3311_v25, 6  ;;  %v634_v27 = vrot.slane %v3321_v28, 6 }
  0x19   :  { %2890 = vmatmul.mubr.msk.f32.gmra.mxu0 %vm725_vm1, %v552_v55  ;;  %v3498_v21 = vsel %vm658_vm4, %v630_v17, %v631_v20  ;;  %v3502_v22 = vsel %vm658_vm4, %v631_v20, %v632_v23  ;;  %v635_v36 = vrot.slane %v3326_v29, 6  ;;  %v636_v37 = vrot.slane %v3331_v30, 6  ;;  %v3597_v17 = vld [vmem:[%s4568_s0 + $0xb8] sm:$0xff]  ;;  %v3602_v20 = vld [vmem:[%s4568_s0 + $0xc0] sm:$0xff] }
  0x1a   :  { %2946 = vmatmul.mubr.msk.f32.gmra.mxu1 %vm725_vm1, %v3354_v34  ;;  %2892 = vmatprep.mubr.msk.f32.mxu0 %vm725_vm1, %v551_v57  ;;  %v3511_v25 = vsel %vm658_vm4, %v632_v23, %v633_v26  ;;  %v637_v38 = vrot.slane %v3336_v31, 6  ;;  %v638_v39 = vrot.slane %v3341_v32, 6  ;;  %v3518_v28 = vsel %vm658_vm4, %v633_v26, %v634_v27  ;;  %v3607_v23 = vld [vmem:[%s4568_s0 + $0xc8] sm:$0xff] }
  0x1b   :  { %2948 = vmatprep.mubr.msk.f32.mxu1 %vm725_vm1, %v3370_v40  ;;  %v3522_v29 = vsel %vm658_vm4, %v634_v27, %v635_v36  ;;  %v639_v42 = vrot.slane %v3354_v34, 6  ;;  %v640_v43 = vrot.slane %v3370_v40, 6  ;;  %v3528_v44 = vsel %vm658_vm4, %v635_v36, %v636_v37  ;;  %v3545_v34 = vld [vmem:[%s4568_s0 + $0x98] sm:$0xff] }
  0x1c   :  { %v3532_v30 = vsel %vm658_vm4, %v636_v37, %v637_v38  ;;  %v3536_v31 = vsel %vm658_vm4, %v637_v38, %v638_v39  ;;  %v641_v32 = vrot.slane %v3388_v47, 6  ;;  %vm3557_vm7 = vcmp.ge.s32.totalorder %v197_v49, 2  ;;  %v3578_v49 = vld [vmem:[%s4568_s0 + $0xb0] sm:$0xff] }
  0x1d   :  { %2893 = vmatmul.mubr.msk.f32.gmra.mxu0 %vm725_vm1, %v550_v58  ;;  %v3549_v40 = vsel %vm658_vm4, %v638_v39, %v639_v42  ;;  %v3553_v45 = vsel %vm658_vm4, %v639_v42, %v640_v43  ;;  %v643_v54 = vrot.slane %v3399_v51, 6  ;;  %v644_v55 = vrot.slane %v3415_v56, 6  ;;  %v3631_v38 = vld [vmem:[%s4568_s0 + $0xd0] sm:$0xff]  ;;  %v3636_v39 = vld [vmem:[%s4568_s0 + $0xd8] sm:$0xff]  ;;  %v3641_v42 = vld [vmem:[%s4568_s0 + $0xe0] sm:$0xff] }
  0x1e   :  { %2949 = vmatmul.mubr.msk.f32.gmra.mxu1 %vm725_vm1, %v3388_v47  ;;  %v642_v47 = vrot.slane %v3375_v41, 6  ;;  %2895 = vmatprep.mubr.msk.f32.mxu0 %vm725_vm1, %v549_v59  ;;  %v3582_v53 = vsel %vm658_vm4, %v640_v43, %v641_v32  ;;  %v645_v57 = vrot.slane %v3545_v34, 6  ;;  %v646_v59 = vrot.slane %v3568_v48, 6 }
  0x1f   :  { %2951 = vmatprep.mubr.msk.f32.mxu1 %vm725_vm1, %v3375_v41  ;;  %v647_v60 = vrot.slane %v3573_v35, 6  ;;  %v648_v16 = vrot.slane %v3578_v49, 6  ;;  %v3618_v36 = vsel %vm658_vm4, %v643_v54, %v644_v55  ;;  %v654_v26 = vrot.slane %v3641_v42, 6 }
  0x20   :  { %v3589_v58 = vsel %vm658_vm4, %v641_v32, %v642_v47  ;;  %v3614_v27 = vsel %vm658_vm4, %v642_v47, %v643_v54  ;;  %v3622_v37 = vsel %vm658_vm4, %v644_v55, %v645_v57  ;;  %v649_v47 = vrot.slane %v3597_v17, 6  ;;  %v3663_v54 = vld [vmem:[%s4568_s0 + $0xe8] sm:$0xff]  ;;  %v3668_v55 = vld [vmem:[%s4568_s0 + $0xf0] sm:$0xff] }
  0x21   :  { %2896 = vmatmul.mubr.msk.f32.gmra.mxu0 %vm725_vm1, %v3426_v61  ;;  %v3645_v61 = vsel %vm658_vm4, %v645_v57, %v646_v59  ;;  %v3649_v43 = vsel %vm658_vm4, %v646_v59, %v647_v60  ;;  %v3653_v32 = vsel %vm658_vm4, %v647_v60, %v648_v16  ;;  %v650_v57 = vrot.slane %v3602_v20, 6 }
  0x22   :  { %2952 = vmatmul.mubr.msk.f32.gmra.mxu1 %vm725_vm1, %v3399_v51  ;;  %2898 = vmatprep.mubr.msk.f32.mxu0 %vm725_vm1, %v3441_v4  ;;  %v651_v59 = vrot.slane %v3607_v23, 6  ;;  %v652_v60 = vrot.slane %v3631_v38, 6  ;;  %v653_v4 = vrot.slane %v3636_v39, 6  ;;  %v3676_v3 = vsel %vm658_vm4, %v648_v16, %v649_v47 }
  0x23   :  { %2954 = vmatprep.mubr.msk.f32.mxu1 %vm725_vm1, %v3415_v56  ;;  %v655_v15 = vrot.slane %v3663_v54, 6  ;;  %v656_v52 = vrot.slane %v3668_v55, 6  ;;  %v3683_v19 = vsel %vm658_vm4, %v649_v47, %v650_v57  ;;  %v4586_v9 = vrot.slane %v3415_v56, 7 }
  0x24   :  { %v3687_v5 = vsel %vm658_vm4, %v650_v57, %v651_v59  ;;  %v3691_v11 = vsel %vm658_vm4, %v651_v59, %v652_v60  ;;  %v3695_v16 = vsel %vm658_vm4, %v652_v60, %v653_v4  ;;  %v3703_v47 = vsel %vm658_vm4, %v653_v4, %v654_v26 }
  0x25   :  { %2899 = vmatmul.mubr.msk.f32.gmra.mxu0 %vm725_vm1, %v3472_v18  ;;  %v3707_v57 = vsel %vm658_vm4, %v654_v26, %v655_v15  ;;  %v3711_v59 = vsel %vm658_vm4, %v655_v15, %v656_v52  ;;  %v544_v18 = vsel %vm529_vm2, %v513_v50, %v514_v62  ;;  %v516_v26 = vrot.slane %v3545_v34, 7 }
  0x26   :  { %2955 = vmatmul.mubr.msk.f32.gmra.mxu1 %vm725_vm1, %v3545_v34  ;;  %2901 = vmatprep.mubr.msk.f32.mxu0 %vm725_vm1, %v578_v24  ;;  %v3731_v7 = vsel %vm658_vm4, %v656_v52, %v657_v0  ;;  %v543_v41 = vsel %vm529_vm2, %v514_v62, %v4586_v9  ;;  %v517_v50 = vrot.slane %v3568_v48, 7  ;;  %v4587_v15 = vmov %v4586_v9 }
  0x27   :  { %2957 = vmatprep.mubr.msk.f32.mxu1 %vm725_vm1, %v3568_v48  ;;  %v542_v52 = vsel %vm529_vm2, %v4587_v15, %v516_v26  ;;  %v518_v0 = vrot.slane %v3573_v35, 7  ;;  %v519_v62 = vrot.slane %v3578_v49, 7  ;;  %v520_v24 = vrot.slane %v3597_v17, 7 }
  0x28   :  { %v541_v51 = vsel %vm529_vm2, %v516_v26, %v517_v50  ;;  %v521_v48 = vrot.slane %v3602_v20, 7  ;;  %v4590_v15 = vrot.slane %v3227_v1, 6  ;;  %vm1801_vm14 = vcmask 261120  }
  0x29   :  { %2902 = vmatmul.mubr.msk.f32.gmra.mxu0 %vm725_vm1, %v544_v18  ;;  %v540_v56 = vsel %vm529_vm2, %v517_v50, %v518_v0  ;;  %v539_v34 = vsel %vm529_vm2, %v518_v0, %v519_v62  ;;  %v627_v50 = vrot.slane %v3240_v6, 6  ;;  %v4591_v0 = vrot.slane %v3254_v10, 6 }
  0x2a   :  { %2958 = vmatmul.mubr.msk.f32.gmra.mxu1 %vm725_vm1, %v3573_v35  ;;  %2904 = vmatprep.mubr.msk.f32.mxu0 %vm725_vm1, %v543_v41  ;;  %v538_v35 = vsel %vm529_vm2, %v519_v62, %v520_v24  ;;  %v4588_v41 = vrot.slane %v3232_v2, 7  ;;  %vm3191_vm15 = vmmov 0  }
  0x2b   :  { %2960 = vmatprep.mubr.msk.f32.mxu1 %vm725_vm1, %v3578_v49  ;;  %v522_v49 = vrot.slane %v3607_v23, 7 }
  0x2d   :  { %2905 = vmatmul.mubr.msk.f32.gmra.mxu0 %vm725_vm1, %v542_v52  ;;  %v536_v60 = vsel %vm529_vm2, %v521_v48, %v522_v49  ;;  %v689_v52 = vsel %vm658_vm4, %v4590_v15, %v627_v50 }
  0x2e   :  { %2961 = vmatmul.mubr.msk.f32.gmra.mxu1 %vm725_vm1, %v3597_v17  ;;  %2907 = vmatprep.mubr.msk.f32.mxu0 %vm725_vm1, %v541_v51  ;;  %v537_v17 = vsel %vm529_vm2, %v520_v24, %v521_v48  ;;  %v688_v51 = vsel %vm658_vm4, %v627_v50, %v4591_v0 }
  0x2f   :  { %2963 = vmatprep.mubr.msk.f32.mxu1 %vm725_vm1, %v3602_v20  ;;  %v523_v20 = vrot.slane %v3631_v38, 7 }
  0x31   :  { %2908 = vmatmul.mubr.msk.f32.gmra.mxu0 %vm725_vm1, %v540_v56  ;;  %v535_v4 = vsel %vm529_vm2, %v522_v49, %v523_v20 }
  0x32   :  { %2964 = vmatmul.mubr.msk.f32.gmra.mxu1 %vm725_vm1, %v3607_v23  ;;  %2910 = vmatprep.mubr.msk.f32.mxu0 %vm725_vm1, %v539_v34  ;;  %v524_v23 = vrot.slane %v3636_v39, 7 }
  0x33   :  { %2966 = vmatprep.mubr.msk.f32.mxu1 %vm725_vm1, %v3631_v38  ;;  %v525_v38 = vrot.slane %v3641_v42, 7 }
  0x34   :  { %v534_v18 = vsel %vm529_vm2, %v523_v20, %v524_v23 }
  0x35   :  { %2911 = vmatmul.mubr.msk.f32.gmra.mxu0 %vm725_vm1, %v538_v35  ;;  %v533_v26 = vsel %vm529_vm2, %v524_v23, %v525_v38 }
  0x36   :  { %2967 = vmatmul.mubr.msk.f32.gmra.mxu1 %vm725_vm1, %v3636_v39  ;;  %2913 = vmatprep.mubr.msk.f32.mxu0 %vm725_vm1, %v537_v17  ;;  %v526_v39 = vrot.slane %v3663_v54, 7 }
  0x37   :  { %2969 = vmatprep.mubr.msk.f32.mxu1 %vm725_vm1, %v3641_v42  ;;  %v527_v42 = vrot.slane %v3668_v55, 7 }
  0x38   :  { %v532_v9 = vsel %vm529_vm2, %v525_v38, %v526_v39 }
  0x39   :  { %2914 = vmatmul.mubr.msk.f32.gmra.mxu0 %vm725_vm1, %v536_v60 }
  0x3a   :  { %2970 = vmatmul.mubr.msk.f32.gmra.mxu1 %vm725_vm1, %v3663_v54  ;;  %2916 = vmatprep.mubr.msk.f32.mxu0 %vm725_vm1, %v535_v4  ;;  %v531_v54 = vsel %vm529_vm2, %v526_v39, %v527_v42 }
  0x3b   :  { %2972 = vmatprep.mubr.msk.f32.mxu1 %vm725_vm1, %v3668_v55  ;;  %v530_v55 = vsel %vm529_vm2, %v527_v42, %v4588_v41  ;;  %v4003_v41 = vld [vmem:[%s4569_s1 + $0x60] sm:$0xff] }
  0x3c   :  { %4596 = vst [vmem:[#allocation8_spill] sm:$0xff] %v4003_v41 }
  0x3d   :  { %2917 = vmatmul.mubr.msk.f32.gmra.mxu0 %vm725_vm1, %v534_v18 }
  0x3e   :  { %2973 = vmatmul.mubr.msk.f32.gmra.mxu1 %vm725_vm1, %v3232_v2  ;;  %2919 = vmatprep.mubr.msk.f32.mxu0 %vm725_vm1, %v533_v26  ;;  %v4589_v2 = vsel %vm3431_vm5, %v3465_v13, 0.0 }
  0x41   :  { %2920 = vmatmul.mubr.msk.f32.gmra.mxu0 %vm725_vm1, %v532_v9 }
  0x42   :  { %2922 = vmatprep.mubr.msk.f32.mxu0 %vm725_vm1, %v531_v54  ;;  %v1735_v54 = vsub.s32 0, %v3247_v8 }
  0x44   :  { %v4008_v15 = vrot.slane %v4003_v41, %v1735_v54 }
  0x45   :  { %2923 = vmatmul.mubr.msk.f32.gmra.mxu0 %vm725_vm1, %v530_v55 }
  0x46   :  { %2927 = vmatprep.mubr.msk.f32.mxu0 %vm725_vm1, %v3227_v1  ;;  %v4592_v1 = vsel %vm3557_vm7, %v3589_v58, 0.0  ;;  %v4593_v58 = vlaneseq }
  0x49   :  { %2928 = vmatmul.mubr.msk.f32.vlgmr.msra.gmra.mxu0 %vm725_vm1, %v3240_v6 }
  0x4a   :  { %2976 = vmatpush3.msk.msra.mxu0 %vm822_vm0, %v3346_v33  ;;  %2977 = vmatprep.mubr.msk.f32.mxu0 %vm725_vm1, %v4589_v2  ;;  %vm1998_vm0 = vcmask 254976  }
  0x4d   :  { %2978 = vmatmul.mubr.msk.f32.vlgmr.msra.gmra.mxu0 %vm725_vm1, %v689_v52 }
  0x4e   :  { %2980 = vmatprep.mubr.msk.f32.mxu0 %vm725_vm1, %v688_v51  ;;  %v4014_v51 = vld [vmem:[%s4569_s1 + $0x58] sm:$0xff] }
  0x51   :  { %2981 = vmatmul.mubr.msk.f32.gmra.mxu0 %vm725_vm1, %v3486_v12 }
  0x52   :  { %2983 = vmatprep.mubr.msk.f32.mxu0 %vm725_vm1, %v3490_v14 }
  0x55   :  { %2984 = vmatmul.mubr.msk.f32.gmra.mxu0 %vm725_vm1, %v3498_v21 }
  0x56   :  { %2986 = vmatprep.mubr.msk.f32.mxu0 %vm725_vm1, %v3502_v22 }
  0x59   :  { %2987 = vmatmul.mubr.msk.f32.gmra.mxu0 %vm725_vm1, %v3511_v25 }
  0x5a   :  { %2989 = vmatprep.mubr.msk.f32.mxu0 %vm725_vm1, %v3518_v28 }
  0x5d   :  { %2990 = vmatmul.mubr.msk.f32.gmra.mxu0 %vm725_vm1, %v3522_v29 }
  0x5e   :  { %2992 = vmatprep.mubr.msk.f32.mxu0 %vm725_vm1, %v3528_v44 }
  0x61   :  { %2993 = vmatmul.mubr.msk.f32.gmra.mxu0 %vm725_vm1, %v3532_v30 }
  0x62   :  { %2995 = vmatprep.mubr.msk.f32.mxu0 %vm725_vm1, %v3536_v31 }
  0x65   :  { %2996 = vmatmul.mubr.msk.f32.gmra.mxu0 %vm725_vm1, %v3549_v40 }
  0x66   :  { %2998 = vmatprep.mubr.msk.f32.mxu0 %vm725_vm1, %v3553_v45 }
  0x69   :  { %2999 = vmatmul.mubr.msk.f32.gmra.mxu0 %vm725_vm1, %v3582_v53 }
  0x6a   :  { %3001 = vmatprep.mubr.msk.f32.mxu0 %vm725_vm1, %v4592_v1 }
  0x6d   :  { %3002 = vmatmul.mubr.msk.f32.gmra.mxu0 %vm725_vm1, %v3614_v27  ;;  %v1835_v27 = vand.u32 127, %v4593_v58 }
  0x6e   :  { %3004 = vmatprep.mubr.msk.f32.mxu0 %vm725_vm1, %v3618_v36  ;;  %v1837_v36 = vmul.u32 128, %v3247_v8 }
  0x70   :  { %vm1838_vm12 = vcmp.ge.s32.totalorder %v1835_v27, %v1837_v36 }
  0x71   :  { %3005 = vmatmul.mubr.msk.f32.gmra.mxu0 %vm725_vm1, %v3622_v37 }
  0x72   :  { %3007 = vmatprep.mubr.msk.f32.mxu0 %vm725_vm1, %v3645_v61 }
  0x75   :  { %3008 = vmatmul.mubr.msk.f32.gmra.mxu0 %vm725_vm1, %v3649_v43  ;;  %v1836_v43 = vadd.s32 128, %v1835_v27 }
  0x76   :  { %3010 = vmatprep.mubr.msk.f32.mxu0 %vm725_vm1, %v3653_v32  ;;  %v1840_v32 = vadd.s32 128, %v1837_v36 }
  0x77   :  { %vm1839_vm8 = vcmp.ge.s32.totalorder %v1836_v43, %v1837_v36 }
  0x78   :  { %vm1842_vm9 = vcmp.lt.s32.totalorder %v1836_v43, %v1840_v32  ;;  %vm1841_vm10 = vcmp.lt.s32.totalorder %v1835_v27, %v1840_v32 }
  0x79   :  { %3011 = vmatmul.mubr.msk.f32.gmra.mxu0 %vm725_vm1, %v3676_v3  ;;  %vm1844_vm11 = vmand %vm1839_vm8, %vm1842_vm9 }
  0x7a   :  { %3013 = vmatprep.mubr.msk.f32.mxu0 %vm725_vm1, %v3683_v19  ;;  %vm3959_vm13 = vmand %vm1838_vm12, %vm1841_vm10 }
  0x7d   :  { %3014 = vmatmul.mubr.msk.f32.gmra.mxu0 %vm725_vm1, %v3687_v5 }
  0x7e   :  { %3016 = vmatprep.mubr.msk.f32.mxu0 %vm725_vm1, %v3691_v11 }
  0x81   :  { %3017 = vmatmul.mubr.msk.f32.gmra.mxu0 %vm725_vm1, %v3695_v16 }
  0x82   :  { %3019 = vmatprep.mubr.msk.f32.mxu0 %vm725_vm1, %v3703_v47 }
  0x85   :  { %3020 = vmatmul.mubr.msk.f32.gmra.mxu0 %vm725_vm1, %v3707_v57 }
  0x86   :  { %3022 = vmatprep.mubr.msk.f32.mxu0 %vm725_vm1, %v3711_v59  ;;  %v4577_v59 = vmov 0.0078125  }
  0x87   :  { %2620 = vmatprep.mubr.msk.f32.mxu1 %vm1844_vm11, %v4577_v59 }
  0x89   :  { %3023 = vmatmul.mubr.msk.f32.gmra.mxu0 %vm725_vm1, %v3731_v7  ;;  %v1918_v7 = vld [vmem:[%s4569_s1 + $0x20] sm:$0xff] }
  0x8a   :  { %2829 = vmatprep.mubr.msk.f32.mxu0 %vm1801_vm14, %v4014_v51 }
  0xc6   :  { %v3910_v63 = vpop.f32.mrf.mxu1 }
  0xc8   :  { %v3916_v19 = vpop.f32.mrf.mxu1 }
  0xc9   :  { %v3900_v3 = vpop.f32.mrf.mxu0 }
  0xca   :  { %v3922_v21 = vpop.f32.mrf.mxu1 }
  0xcb   :  { %v3902_v5 = vpop.f32.mrf.mxu0 }
  0xcc   :  { %v3928_v28 = vpop.f32.mrf.mxu1 }
  0xcd   :  { %v3904_v6 = vpop.f32.mrf.mxu0 }
  0xce   :  { %v3934_v30 = vpop.f32.mrf.mxu1  ;;  %v1232_v43 = vadd.f32 %v3910_v63, %v3904_v6 }
  0xcf   :  { %v3906_v10 = vpop.f32.mrf.mxu0 }
  0xd0   :  { %v3940_v45 = vpop.f32.mrf.mxu1 }
  0xd1   :  { %v3908_v33 = vpop.f32.mrf.mxu0 }
  0xd2   :  { %v3948_v37 = vpop.f32.mrf.mxu1  ;;  %v1242_v41 = vadd.f32 %v3922_v21, %v3908_v33 }
  0xd3   :  { %v3912_v11 = vpop.f32.mrf.mxu0 }
  0xd4   :  { %v3954_v47 = vpop.f32.mrf.mxu1 }
  0xd5   :  { %v3914_v13 = vpop.f32.mrf.mxu0 }
  0xd6   :  { %v3965_v56 = vpop.f32.mrf.mxu1 }
  0xd7   :  { %v3918_v12 = vpop.f32.mrf.mxu0 }
  0xd8   :  { %v3971_v48 = vpop.f32.mrf.mxu1 }
  0xd9   :  { %v3920_v14 = vpop.f32.mrf.mxu0 }
  0xda   :  { %v3977_v17 = vpop.f32.mrf.mxu1 }
  0xdb   :  { %v3924_v22 = vpop.f32.mrf.mxu0 }
  0xdc   :  { %v3983_v23 = vpop.f32.mrf.mxu1 }
  0xdd   :  { %v3926_v25 = vpop.f32.mrf.mxu0 }
  0xde   :  { %v3989_v18 = vpop.f32.mrf.mxu1 }
  0xdf   :  { %v3930_v29 = vpop.f32.mrf.mxu0 }
  0xe0   :  { %v3995_v42 = vpop.f32.mrf.mxu1 }
  0xe1   :  { %v3932_v44 = vpop.f32.mrf.mxu0 }
  0xe2   :  { %v4005_v50 = vpop.f32.mrf.mxu1 }
  0xe3   :  { %v3936_v31 = vpop.f32.mrf.mxu0 }
  0xe4   :  { %v4019_v27 = vpop.f32.mrf.mxu1 }
  0xe5   :  { %v3938_v40 = vpop.f32.mrf.mxu0 }
  0xe7   :  { %v3942_v46 = vpop.f32.mrf.mxu0 }
  0xe9   :  { %v3944_v53 = vpop.f32.mrf.mxu0 }
  0xeb   :  { %v3950_v61 = vpop.f32.mrf.mxu0 }
  0xed   :  { %v3952_v16 = vpop.f32.mrf.mxu0 }
  0xef   :  { %v3956_v57 = vpop.f32.mrf.mxu0 }
  0xf1   :  { %v3963_v62 = vpop.f32.mrf.mxu0 }
  0xf3   :  { %v3967_v24 = vpop.f32.mrf.mxu0 }
  0xf5   :  { %v3969_v34 = vpop.f32.mrf.mxu0 }
  0xf7   :  { %v3973_v35 = vpop.f32.mrf.mxu0 }
  0xf9   :  { %v3975_v49 = vpop.f32.mrf.mxu0 }
  0xfb   :  { %v3979_v20 = vpop.f32.mrf.mxu0 }
  0xfd   :  { %v3981_v60 = vpop.f32.mrf.mxu0 }
  0xff   :  { %v3985_v4 = vpop.f32.mrf.mxu0 }
 0x101   :  { %v3987_v38 = vpop.f32.mrf.mxu0 }
 0x103   :  { %v3991_v39 = vpop.f32.mrf.mxu0 }
 0x105   :  { %v3993_v26 = vpop.f32.mrf.mxu0 }
 0x107   :  { %v3997_v9 = vpop.f32.mrf.mxu0 }
 0x109   :  { %v2929_v55 = vpop.f32.mrf.mxu0 }
 0x10a   :  { %v1222_v52 = vadd.f32 %v2929_v55, %v3900_v3  ;;  %v1227_v55 = vadd.f32 %v3916_v19, %v3906_v10 }
 0x10b   :  { %v1216_v2 = vpop.f32.mrf.mxu0 }
 0x10c   :  { %v1217_v1 = vadd.f32 %v1216_v2, %v3902_v5 }
 0x10d   :  { %v2979_v0 = vpop.f32.mrf.mxu0 }
 0x10e   :  { %v1701_v58 = vadd.f32 %v2979_v0, %v1222_v52  ;;  %v4029_v52 = vpop.f32.mrf.mxu1 }
 0x10f   :  { %v1541_v36 = vpop.f32.mrf.mxu0 }
 0x110   :  { %v1738_v3 = vadd.f32 %v4008_v15, %v1701_v58  ;;  %v1700_v32 = vadd.f32 %v1541_v36, %v1217_v1  ;;  %v1237_v1 = vadd.f32 %v3928_v28, %v3912_v11  ;;  %v4051_v36 = vpop.f32.mrf.mxu1 }
 0x111   :  { %v2982_v54 = vpop.f32.mrf.mxu0 }
 0x112   :  { %v4026_v59 = vmax.f32 %v1738_v3, 0.0  ;;  %v1737_v5 = vadd.f32 %v4008_v15, %v1700_v32  ;;  %v1703_v2 = vadd.f32 %v2982_v54, %v1232_v43  ;;  %v1252_v3 = vadd.f32 %v3934_v30, %v3914_v13 }
 0x113   :  { %v1551_v0 = vpop.f32.mrf.mxu0 }
 0x114   :  { %1803 = vst.msk [vmem:[%s4570_s2 + $0x8] sm:$0xff] %vm1801_vm14, %v4026_v59  ;;  %v4038_v6 = vmax.f32 %v1737_v5, 0.0  ;;  %v1740_v10 = vadd.f32 %v4008_v15, %v1703_v2  ;;  %v1702_v63 = vadd.f32 %v1551_v0, %v1227_v55  ;;  %v4073_v5 = vpop.f32.mrf.mxu1  ;;  %v1262_v0 = vadd.f32 %v3948_v37, %v3920_v14 }
 0x115   :  { %v2985_v19 = vpop.f32.mrf.mxu0 }
 0x116   :  { %1802 = vst.msk [vmem:[%s4570_s2] sm:$0xff] %vm1801_vm14, %v4038_v6  ;;  %v4048_v33 = vmax.f32 %v1740_v10, 0.0  ;;  %v1739_v21 = vadd.f32 %v4008_v15, %v1702_v63  ;;  %v1705_v58 = vadd.f32 %v2985_v19, %v1242_v41  ;;  %v1247_v41 = vadd.f32 %v3940_v45, %v3918_v12 }
 0x117   :  { %v1561_v43 = vpop.f32.mrf.mxu0  ;;  %v1257_v19 = vadd.f32 %v3954_v47, %v3924_v22 }
 0x118   :  { %1805 = vst.msk [vmem:[%s4570_s2 + $0x18] sm:$0xff] %vm1801_vm14, %v4048_v33  ;;  %v4060_v11 = vmax.f32 %v1739_v21, 0.0  ;;  %v1742_v28 = vadd.f32 %v4008_v15, %v1705_v58  ;;  %v1704_v32 = vadd.f32 %v1561_v43, %v1237_v1  ;;  %v4095_v21 = vpop.f32.mrf.mxu1  ;;  %v1272_v43 = vadd.f32 %v3965_v56, %v3926_v25 }
 0x119   :  { %v2988_v54 = vpop.f32.mrf.mxu0 }
 0x11a   :  { %1804 = vst.msk [vmem:[%s4570_s2 + $0x10] sm:$0xff] %vm1801_vm14, %v4060_v11  ;;  %v4070_v13 = vmax.f32 %v1742_v28, 0.0  ;;  %v1741_v30 = vadd.f32 %v4008_v15, %v1704_v32  ;;  %v1707_v55 = vadd.f32 %v2988_v54, %v1252_v3  ;;  %v1267_v32 = vadd.f32 %v3971_v48, %v3930_v29 }
 0x11b   :  { %v1571_v2 = vpop.f32.mrf.mxu0 }
 0x11c   :  { %1807 = vst.msk [vmem:[%s4570_s2 + $0x28] sm:$0xff] %vm1801_vm14, %v4070_v13  ;;  %v4082_v12 = vmax.f32 %v1741_v30, 0.0  ;;  %v1744_v45 = vadd.f32 %v4008_v15, %v1707_v55  ;;  %v1706_v10 = vadd.f32 %v1571_v2, %v1247_v41  ;;  %v4117_v41 = vpop.f32.mrf.mxu1  ;;  %v1282_v55 = vadd.f32 %v3977_v17, %v3932_v44 }
 0x11d   :  { %v2991_v63 = vpop.f32.mrf.mxu0 }
 0x11e   :  { %1806 = vst.msk [vmem:[%s4570_s2 + $0x20] sm:$0xff] %vm1801_vm14, %v4082_v12  ;;  %v4092_v14 = vmax.f32 %v1744_v45, 0.0  ;;  %v1743_v37 = vadd.f32 %v4008_v15, %v1706_v10  ;;  %v1709_v1 = vadd.f32 %v2991_v63, %v1262_v0  ;;  %v1277_v45 = vadd.f32 %v3983_v23, %v3936_v31  ;;  %v1326_v63 = vpop.f32.mrf.mxu1 }
 0x11f   :  { %v1581_v58 = vpop.f32.mrf.mxu0 }
 0x120   :  { %1809 = vst.msk [vmem:[%s4570_s2 + $0x38] sm:$0xff] %vm1801_vm14, %v4092_v14  ;;  %v4104_v22 = vmax.f32 %v1743_v37, 0.0  ;;  %v1746_v47 = vadd.f32 %v4008_v15, %v1709_v1  ;;  %v1708_v3 = vadd.f32 %v1581_v58, %v1257_v19  ;;  %v1292_v37 = vadd.f32 %v3989_v18, %v3938_v40 }
 0x121   :  { %v2994_v28 = vpop.f32.mrf.mxu0 }
 0x122   :  { %1808 = vst.msk [vmem:[%s4570_s2 + $0x30] sm:$0xff] %vm1801_vm14, %v4104_v22  ;;  %v4114_v25 = vmax.f32 %v1746_v47, 0.0  ;;  %v1745_v56 = vadd.f32 %v4008_v15, %v1708_v3  ;;  %v1711_v54 = vadd.f32 %v2994_v28, %v1272_v43  ;;  %v1287_v43 = vadd.f32 %v3995_v42, %v3942_v46  ;;  %v2965_v3 = vpop.f32.mrf.mxu1 }
 0x123   :  { %v1591_v30 = vpop.f32.mrf.mxu0 }
 0x124   :  { %1811 = vst.msk [vmem:[%s4570_s2 + $0x48] sm:$0xff] %vm1801_vm14, %v4114_v25  ;;  %v4126_v29 = vmax.f32 %v1745_v56, 0.0  ;;  %v1748_v48 = vadd.f32 %v4008_v15, %v1711_v54  ;;  %v1710_v2 = vadd.f32 %v1591_v30, %v1267_v32  ;;  %v1302_v32 = vadd.f32 %v4005_v50, %v3944_v53 }
 0x125   :  { %v2997_v0 = vpop.f32.mrf.mxu0  ;;  %v1297_v30 = vadd.f32 %v4019_v27, %v3950_v61 }
 0x126   :  { %1810 = vst.msk [vmem:[%s4570_s2 + $0x40] sm:$0xff] %vm1801_vm14, %v4126_v29  ;;  %v4136_v44 = vmax.f32 %v1748_v48, 0.0  ;;  %v1747_v17 = vadd.f32 %v4008_v15, %v1710_v2  ;;  %v1713_v10 = vadd.f32 %v2997_v0, %v1282_v55  ;;  %v1336_v48 = vpop.f32.mrf.mxu1  ;;  %v1312_v0 = vadd.f32 %v4029_v52, %v3952_v16 }
 0x127   :  { %v1601_v19 = vpop.f32.mrf.mxu0 }
 0x128   :  { %1813 = vst.msk [vmem:[%s4570_s2 + $0x58] sm:$0xff] %vm1801_vm14, %v4136_v44  ;;  %v4146_v31 = vmax.f32 %v1747_v17, 0.0  ;;  %v1750_v23 = vadd.f32 %v4008_v15, %v1713_v10  ;;  %v1712_v1 = vadd.f32 %v1601_v19, %v1277_v45  ;;  %v1307_v10 = vadd.f32 %v4051_v36, %v3956_v57 }
 0x129   :  { %v3000_v58 = vpop.f32.mrf.mxu0 }
 0x12a   :  { %1812 = vst.msk [vmem:[%s4570_s2 + $0x50] sm:$0xff] %vm1801_vm14, %v4146_v31  ;;  %v4156_v40 = vmax.f32 %v1750_v23, 0.0  ;;  %v1749_v18 = vadd.f32 %v4008_v15, %v1712_v1  ;;  %v1715_v47 = vadd.f32 %v3000_v58, %v1292_v37  ;;  %v2968_v37 = vpop.f32.mrf.mxu1  ;;  %v1322_v1 = vadd.f32 %v4073_v5, %v3963_v62 }
 0x12b   :  { %v1611_v28 = vpop.f32.mrf.mxu0 }
 0x12c   :  { %1815 = vst.msk [vmem:[%s4570_s2 + $0x68] sm:$0xff] %vm1801_vm14, %v4156_v40  ;;  %v4166_v46 = vmax.f32 %v1749_v18, 0.0  ;;  %v1752_v42 = vadd.f32 %v4008_v15, %v1715_v47  ;;  %v1714_v56 = vadd.f32 %v1611_v28, %v1287_v43  ;;  %v1317_v18 = vadd.f32 %v4095_v21, %v3967_v24  ;;  %v1346_v28 = vpop.f32.mrf.mxu1 }
 0x12d   :  { %v3003_v54 = vpop.f32.mrf.mxu0 }
 0x12e   :  { %1814 = vst.msk [vmem:[%s4570_s2 + $0x60] sm:$0xff] %vm1801_vm14, %v4166_v46  ;;  %v4176_v53 = vmax.f32 %v1752_v42, 0.0  ;;  %v1751_v50 = vadd.f32 %v4008_v15, %v1714_v56  ;;  %v1717_v55 = vadd.f32 %v3003_v54, %v1302_v32  ;;  %v1332_v42 = vadd.f32 %v4117_v41, %v3969_v34 }
 0x12f   :  { %v1621_v2 = vpop.f32.mrf.mxu0 }
 0x130   :  { %1817 = vst.msk [vmem:[%s4570_s2 + $0x78] sm:$0xff] %vm1801_vm14, %v4176_v53  ;;  %v4186_v61 = vmax.f32 %v1751_v50, 0.0  ;;  %v1754_v27 = vadd.f32 %v4008_v15, %v1717_v55  ;;  %v1716_v45 = vadd.f32 %v1621_v2, %v1297_v30  ;;  %v1327_v30 = vadd.f32 %v1326_v63, %v3973_v35  ;;  %v2971_v55 = vpop.f32.mrf.mxu1 }
 0x131   :  { %v3006_v17 = vpop.f32.mrf.mxu0 }
 0x132   :  { %1816 = vst.msk [vmem:[%s4570_s2 + $0x70] sm:$0xff] %vm1801_vm14, %v4186_v61  ;;  %v4196_v16 = vmax.f32 %v1754_v27, 0.0  ;;  %v1753_v52 = vadd.f32 %v4008_v15, %v1716_v45  ;;  %v1719_v19 = vadd.f32 %v3006_v17, %v1312_v0  ;;  %v1342_v0 = vadd.f32 %v2965_v3, %v3975_v49 }
 0x133   :  { %v1631_v23 = vpop.f32.mrf.mxu0  ;;  %v1337_v17 = vadd.f32 %v1336_v48, %v3979_v20 }
 0x134   :  { %1819 = vst.msk [vmem:[%s4570_s2 + $0x88] sm:$0xff] %vm1801_vm14, %v4196_v16  ;;  %v4206_v57 = vmax.f32 %v1753_v52, 0.0  ;;  %v1756_v36 = vadd.f32 %v4008_v15, %v1719_v19  ;;  %v1718_v58 = vadd.f32 %v1631_v23, %v1307_v10  ;;  %v1356_v52 = vpop.f32.mrf.mxu1  ;;  %v1352_v23 = vadd.f32 %v2968_v37, %v3981_v60 }
 0x135   :  { %v3009_v43 = vpop.f32.mrf.mxu0 }
 0x136   :  { %1818 = vst.msk [vmem:[%s4570_s2 + $0x80] sm:$0xff] %vm1801_vm14, %v4206_v57  ;;  %v4216_v62 = vmax.f32 %v1756_v36, 0.0  ;;  %v1755_v5 = vadd.f32 %v4008_v15, %v1718_v58  ;;  %v1721_v47 = vadd.f32 %v3009_v43, %v1322_v1  ;;  %v1347_v58 = vadd.f32 %v1346_v28, %v3985_v4 }
 0x137   :  { %v1641_v32 = vpop.f32.mrf.mxu0 }
 0x138   :  { %1821 = vst.msk [vmem:[%s4570_s2 + $0x98] sm:$0xff] %vm1801_vm14, %v4216_v62  ;;  %v4226_v24 = vmax.f32 %v1755_v5, 0.0  ;;  %v1758_v21 = vadd.f32 %v4008_v15, %v1721_v47  ;;  %v1720_v56 = vadd.f32 %v1641_v32, %v1317_v18  ;;  %v2974_v18 = vpop.f32.mrf.mxu1  ;;  %v1362_v47 = vadd.f32 %v2971_v55, %v3987_v38 }
 0x139   :  { %v3012_v54 = vpop.f32.mrf.mxu0 }
 0x13a   :  { %1820 = vst.msk [vmem:[%s4570_s2 + $0x90] sm:$0xff] %vm1801_vm14, %v4226_v24  ;;  %v4235_v34 = vmax.f32 %v1758_v21, 0.0  ;;  %v1757_v41 = vadd.f32 %v4008_v15, %v1720_v56  ;;  %v1723_v50 = vadd.f32 %v3012_v54, %v1332_v42  ;;  %v1357_v21 = vadd.f32 %v1356_v52, %v3991_v39 }
 0x13b   :  { %v1651_v2 = vpop.f32.mrf.mxu0 }
 0x13c   :  { %1823 = vst.msk [vmem:[%s4570_s2 + $0xa8] sm:$0xff] %vm1801_vm14, %v4235_v34  ;;  %v4244_v35 = vmax.f32 %v1757_v41, 0.0  ;;  %v1760_v63 = vadd.f32 %v4008_v15, %v1723_v50  ;;  %v1722_v27 = vadd.f32 %v1651_v2, %v1327_v30  ;;  %v1366_v30 = vpop.f32.mrf.mxu1  ;;  %v1372_v50 = vadd.f32 %v2974_v18, %v3993_v26  ;;  %v2002_v18 = vld [vmem:[%s4569_s1 + $0x40] sm:$0xff] }
 0x13d   :  { %v3015_v45 = vpop.f32.mrf.mxu0 }
 0x13e   :  { %1822 = vst.msk [vmem:[%s4570_s2 + $0xa0] sm:$0xff] %vm1801_vm14, %v4244_v35  ;;  %v4253_v49 = vmax.f32 %v1760_v63, 0.0  ;;  %v1759_v3 = vadd.f32 %v4008_v15, %v1722_v27  ;;  %v1725_v10 = vadd.f32 %v3015_v45, %v1342_v0  ;;  %v1367_v63 = vadd.f32 %v1366_v30, %v3997_v9 }
 0x13f   :  { %v1661_v19 = vpop.f32.mrf.mxu0 }
 0x140   :  { %1825 = vst.msk [vmem:[%s4570_s2 + $0xb8] sm:$0xff] %vm1801_vm14, %v4253_v49  ;;  %v4262_v20 = vmax.f32 %v1759_v3, 0.0  ;;  %v1762_v48 = vadd.f32 %v4008_v15, %v1725_v10  ;;  %v1724_v1 = vadd.f32 %v1661_v19, %v1337_v17 }
 0x141   :  { %v3018_v36 = vpop.f32.mrf.mxu0 }
 0x142   :  { %1824 = vst.msk [vmem:[%s4570_s2 + $0xb0] sm:$0xff] %vm1801_vm14, %v4262_v20  ;;  %v4271_v60 = vmax.f32 %v1762_v48, 0.0  ;;  %v1761_v37 = vadd.f32 %v4008_v15, %v1724_v1  ;;  %v1727_v43 = vadd.f32 %v3018_v36, %v1352_v23  ;;  %v4597_v48 = vmov 0.0078125   ;;  %v1919_v36 = vld [vmem:[%s4569_s1 + $0x28] sm:$0xff] }
 0x143   :  { %v1671_v5 = vpop.f32.mrf.mxu0  ;;  %v3190_v1 = vmov 0.0  }
 0x144   :  { %1827 = vst.msk [vmem:[%s4570_s2 + $0xc8] sm:$0xff] %vm1801_vm14, %v4271_v60  ;;  %v4280_v4 = vmax.f32 %v1761_v37, 0.0  ;;  %v1764_v28 = vadd.f32 %v4008_v15, %v1727_v43  ;;  %v1726_v32 = vadd.f32 %v1671_v5, %v1347_v58  ;;  %v1917_v58 = vld [vmem:[%s4569_s1 + $0x18] sm:$0xff] }
 0x145   :  { %v3021_v42 = vpop.f32.mrf.mxu0  ;;  %v2001_v5 = vld [vmem:[%s4569_s1 + $0x38] sm:$0xff] }
 0x146   :  { %1826 = vst.msk [vmem:[%s4570_s2 + $0xc0] sm:$0xff] %vm1801_vm14, %v4280_v4  ;;  %v4289_v38 = vmax.f32 %v1764_v28, 0.0  ;;  %v1763_v56 = vadd.f32 %v4008_v15, %v1726_v32  ;;  %v1729_v54 = vadd.f32 %v3021_v42, %v1362_v47  ;;  %v1923_v42 = vsub.s32 1, %v3247_v8 }
 0x147   :  { %v1681_v41 = vpop.f32.mrf.mxu0 }
 0x148   :  { %1829 = vst.msk [vmem:[%s4570_s2 + $0xd8] sm:$0xff] %vm1801_vm14, %v4289_v38  ;;  %v4298_v39 = vmax.f32 %v1763_v56, 0.0  ;;  %v1766_v55 = vadd.f32 %v4008_v15, %v1729_v54  ;;  %v1728_v2 = vadd.f32 %v1681_v41, %v1357_v21  ;;  %v4598_v21 = vld [vmem:[#allocation8_spill] sm:$0xff] }
 0x149   :  { %v3024_v0 = vpop.f32.mrf.mxu0  ;;  %v1924_v56 = vrot.slane %v4598_v21, %v1923_v42 }
 0x14a   :  { %1828 = vst.msk [vmem:[%s4570_s2 + $0xd0] sm:$0xff] %vm1801_vm14, %v4298_v39  ;;  %v4307_v26 = vmax.f32 %v1766_v55, 0.0  ;;  %v1765_v27 = vadd.f32 %v4008_v15, %v1728_v2  ;;  %v1731_v45 = vadd.f32 %v3024_v0, %v1372_v50 }
 0x14b   :  { %v1691_v17 = vpop.f32.mrf.mxu0 }
 0x14c   :  { %1831 = vst.msk [vmem:[%s4570_s2 + $0xe8] sm:$0xff] %vm1801_vm14, %v4307_v26  ;;  %v4315_v3 = vmax.f32 %v1765_v27, 0.0  ;;  %v1768_v9 = vadd.f32 %v4008_v15, %v1731_v45  ;;  %v1730_v10 = vadd.f32 %v1691_v17, %v1367_v63 }
 0x14e   :  { %1830 = vst.msk [vmem:[%s4570_s2 + $0xe0] sm:$0xff] %vm1801_vm14, %v4315_v3  ;;  %v4323_v52 = vmax.f32 %v1768_v9, 0.0  ;;  %v1767_v19 = vadd.f32 %v4008_v15, %v1730_v10  ;;  %v1920_v15 = vld [vmem:[%s4569_s1 + $0x30] sm:$0xff] }
 0x150   :  { %1833 = vst.msk [vmem:[%s4570_s2 + $0xf8] sm:$0xff] %vm1801_vm14, %v4323_v52  ;;  %v4331_v23 = vmax.f32 %v1767_v19, 0.0  ;;  %2757 = vmatprep.subr.mxu1 %v4323_v52  ;;  %2797 = vmatprep.subr.msk.mxu0 %vm1801_vm14, %v4323_v52 }
 0x151   :  { %2758 = vmatpush3.msra.mxu1 %v4176_v53  ;;  %2798 = vmatpush3.xpose.msk.msra.mxu0 %vm1801_vm14, %v4176_v53 }
 0x152   :  { %1832 = vst.msk [vmem:[%s4570_s2 + $0xf0] sm:$0xff] %vm1801_vm14, %v4331_v23  ;;  %2759 = vmatprep.subr.mxu1 %v4331_v23  ;;  %2799 = vmatprep.subr.msk.mxu0 %vm1801_vm14, %v4331_v23 }
 0x153   :  { %2760 = vmatpush3.msra.mxu1 %v4186_v61 }
 0x154   :  { %2761 = vmatprep.subr.mxu1 %v4307_v26 }
 0x155   :  { %2762 = vmatpush3.msra.mxu1 %v4156_v40  ;;  %2800 = vmatpush3.xpose.msk.msra.mxu0 %vm1801_vm14, %v4186_v61 }
 0x156   :  { %2763 = vmatprep.subr.mxu1 %v4315_v3  ;;  %2801 = vmatprep.subr.msk.mxu0 %vm1801_vm14, %v4307_v26 }
 0x157   :  { %2764 = vmatpush3.msra.mxu1 %v4166_v46 }
 0x158   :  { %2765 = vmatprep.subr.mxu1 %v4289_v38 }
 0x159   :  { %2766 = vmatpush3.msra.mxu1 %v4136_v44  ;;  %2802 = vmatpush3.xpose.msk.msra.mxu0 %vm1801_vm14, %v4156_v40 }
 0x15a   :  { %2767 = vmatprep.subr.mxu1 %v4298_v39  ;;  %2803 = vmatprep.subr.msk.mxu0 %vm1801_vm14, %v4315_v3 }
 0x15b   :  { %2768 = vmatpush3.msra.mxu1 %v4146_v31 }
 0x15c   :  { %2769 = vmatprep.subr.mxu1 %v4271_v60 }
 0x15d   :  { %2770 = vmatpush3.msra.mxu1 %v4114_v25  ;;  %2804 = vmatpush3.xpose.msk.msra.mxu0 %vm1801_vm14, %v4166_v46 }
 0x15e   :  { %2771 = vmatprep.subr.mxu1 %v4280_v4  ;;  %2805 = vmatprep.subr.msk.mxu0 %vm1801_vm14, %v4289_v38 }
 0x15f   :  { %2772 = vmatpush3.msra.mxu1 %v4126_v29 }
 0x160   :  { %2773 = vmatprep.subr.mxu1 %v4253_v49 }
 0x161   :  { %2774 = vmatpush3.msra.mxu1 %v4092_v14  ;;  %2806 = vmatpush3.xpose.msk.msra.mxu0 %vm1801_vm14, %v4136_v44 }
 0x162   :  { %2775 = vmatprep.subr.mxu1 %v4262_v20  ;;  %2807 = vmatprep.subr.msk.mxu0 %vm1801_vm14, %v4298_v39 }
 0x163   :  { %2776 = vmatpush3.msra.mxu1 %v4104_v22 }
 0x164   :  { %2777 = vmatprep.subr.mxu1 %v4235_v34 }
 0x165   :  { %2778 = vmatpush3.msra.mxu1 %v4070_v13  ;;  %2808 = vmatpush3.xpose.msk.msra.mxu0 %vm1801_vm14, %v4146_v31 }
 0x166   :  { %2779 = vmatprep.subr.mxu1 %v4244_v35  ;;  %2809 = vmatprep.subr.msk.mxu0 %vm1801_vm14, %v4271_v60 }
 0x167   :  { %2780 = vmatpush3.msra.mxu1 %v4082_v12 }
 0x168   :  { %2781 = vmatprep.subr.mxu1 %v4216_v62 }
 0x169   :  { %2782 = vmatpush3.msra.mxu1 %v4048_v33  ;;  %2810 = vmatpush3.xpose.msk.msra.mxu0 %vm1801_vm14, %v4114_v25 }
 0x16a   :  { %2783 = vmatprep.subr.mxu1 %v4226_v24  ;;  %2811 = vmatprep.subr.msk.mxu0 %vm1801_vm14, %v4280_v4 }
 0x16b   :  { %2784 = vmatpush3.msra.mxu1 %v4060_v11 }
 0x16c   :  { %2785 = vmatprep.subr.mxu1 %v4196_v16 }
 0x16d   :  { %2786 = vmatpush3.msra.mxu1 %v4026_v59  ;;  %2812 = vmatpush3.xpose.msk.msra.mxu0 %vm1801_vm14, %v4126_v29 }
 0x16e   :  { %2787 = vmatprep.subr.mxu1 %v4206_v57  ;;  %2813 = vmatprep.subr.msk.mxu0 %vm1801_vm14, %v4253_v49 }
 0x16f   :  { %2788 = vmatpush3.msra.mxu1 %v4038_v6 }
 0x170   :  { %2621 = vmatmul.mubr.msk.f32.vlgmr.msra.gmra.mxu1 %vm3959_vm13, %v4597_v48  ;;  %3025 = vmatprep.subr.mxu1 %v3190_v1 }
 0x171   :  { %2814 = vmatpush3.xpose.msk.msra.mxu0 %vm1801_vm14, %v4092_v14  ;;  %3026 = vmatpush3.msra.mxu1 %v1920_v15 }
 0x172   :  { %2815 = vmatprep.subr.msk.mxu0 %vm1801_vm14, %v4262_v20  ;;  %3027 = vmatprep.subr.mxu1 %v3190_v1 }
 0x173   :  { %3028 = vmatpush3.msra.mxu1 %v1919_v36  ;;  %3033 = vmatprep.mubr.msk.f32.mxu1 %vm3191_vm15, %v3190_v1 }
 0x174   :  { %3029 = vmatprep.subr.mxu1 %v3190_v1 }
 0x175   :  { %2816 = vmatpush3.xpose.msk.msra.mxu0 %vm1801_vm14, %v4104_v22  ;;  %3030 = vmatpush3.msra.mxu1 %v1918_v7 }
 0x176   :  { %2817 = vmatprep.subr.msk.mxu0 %vm1801_vm14, %v4235_v34  ;;  %3031 = vmatprep.subr.mxu1 %v3190_v1 }
 0x177   :  { %3032 = vmatpush3.msra.mxu1 %v1917_v58 }
 0x178   :  { %3036 = vmatprep.subr.mxu1 %v3190_v1 }
 0x179   :  { %2818 = vmatpush3.xpose.msk.msra.mxu0 %vm1801_vm14, %v4070_v13 }
 0x17a   :  { %2819 = vmatprep.subr.msk.mxu0 %vm1801_vm14, %v4244_v35 }
 0x17d   :  { %2820 = vmatpush3.xpose.msk.msra.mxu0 %vm1801_vm14, %v4082_v12 }
 0x17e   :  { %2821 = vmatprep.subr.msk.mxu0 %vm1801_vm14, %v4216_v62 }
 0x181   :  { %2822 = vmatpush3.xpose.msk.msra.mxu0 %vm1801_vm14, %v4048_v33 }
 0x182   :  { %2823 = vmatprep.subr.msk.mxu0 %vm1801_vm14, %v4226_v24 }
 0x185   :  { %2824 = vmatpush3.xpose.msk.msra.mxu0 %vm1801_vm14, %v4060_v11 }
 0x186   :  { %2825 = vmatprep.subr.msk.mxu0 %vm1801_vm14, %v4196_v16 }
 0x189   :  { %2826 = vmatpush3.xpose.msk.msra.mxu0 %vm1801_vm14, %v4026_v59 }
 0x18a   :  { %2827 = vmatprep.subr.msk.mxu0 %vm1801_vm14, %v4206_v57 }
 0x18d   :  { %2828 = vmatpush3.xpose.msk.msra.mxu0 %vm1801_vm14, %v4038_v6 }
 0x18e   :  { %3117 = vmatprep.subr.mxu0 %v3190_v1 }
 0x190   :  { %2830 = vmatmul.mubr.msk.f32.vlgmr.msra.gmra.mxu0 %vm1801_vm14, %v4014_v51 }
 0x191   :  { %3125 = vmatprep.mubr.msk.f32.mxu0 %vm3191_vm15, %v3190_v1 }
 0x230   :  { %v2789_v51 = vpop.f32.mrf.mxu1 }
 0x232   :  { %v2790_v37 = vpop.f32.mrf.mxu1 }
 0x233   :  { %v2791_v43 = vadd.f32 %v2790_v37, %v2789_v51 }
 0x235   :  { %3034 = vmatmul.mubr.msk.f32.vlgmr.msra.gmra.mxu1 %vm1801_vm14, %v2791_v43 }
 0x236   :  { %3037 = vmatpush3.msra.mxu1 %v4176_v53  ;;  %3068 = vmatprep.mubr.msk.f32.mxu1 %vm3191_vm15, %v3190_v1 }
 0x237   :  { %3038 = vmatprep.subr.mxu1 %v3190_v1 }
 0x238   :  { %3039 = vmatpush3.msra.mxu1 %v4186_v61  ;;  %v2003_v61 = vld [vmem:[%s4569_s1 + $0x48] sm:$0xff] }
 0x239   :  { %3040 = vmatprep.subr.mxu1 %v3190_v1 }
 0x23a   :  { %3041 = vmatpush3.msra.mxu1 %v4156_v40 }
 0x23b   :  { %3042 = vmatprep.subr.mxu1 %v3190_v1 }
 0x23c   :  { %3043 = vmatpush3.msra.mxu1 %v4166_v46 }
 0x23d   :  { %3044 = vmatprep.subr.mxu1 %v3190_v1 }
 0x23e   :  { %3045 = vmatpush3.msra.mxu1 %v4136_v44 }
 0x23f   :  { %3046 = vmatprep.subr.mxu1 %v3190_v1 }
 0x240   :  { %3047 = vmatpush3.msra.mxu1 %v4146_v31 }
 0x241   :  { %3048 = vmatprep.subr.mxu1 %v3190_v1 }
 0x242   :  { %3049 = vmatpush3.msra.mxu1 %v4114_v25 }
 0x243   :  { %3050 = vmatprep.subr.mxu1 %v3190_v1 }
 0x244   :  { %3051 = vmatpush3.msra.mxu1 %v4126_v29 }
 0x245   :  { %3052 = vmatprep.subr.mxu1 %v3190_v1 }
 0x246   :  { %3053 = vmatpush3.msra.mxu1 %v4092_v14 }
 0x247   :  { %3054 = vmatprep.subr.mxu1 %v3190_v1 }
 0x248   :  { %3055 = vmatpush3.msra.mxu1 %v4104_v22 }
 0x249   :  { %3056 = vmatprep.subr.mxu1 %v3190_v1 }
 0x24a   :  { %3057 = vmatpush3.msra.mxu1 %v4070_v13 }
 0x24b   :  { %3058 = vmatprep.subr.mxu1 %v3190_v1 }
 0x24c   :  { %3059 = vmatpush3.msra.mxu1 %v4082_v12 }
 0x24d   :  { %3060 = vmatprep.subr.mxu1 %v3190_v1 }
 0x24e   :  { %3061 = vmatpush3.msra.mxu1 %v4048_v33 }
 0x24f   :  { %3062 = vmatprep.subr.mxu1 %v3190_v1 }
 0x250   :  { %3063 = vmatpush3.msra.mxu1 %v4060_v11  ;;  %v2170_v14 = vpop.f32.mrf.mxu0 }
 0x251   :  { %v2175_v25 = vmul.f32 0.17677669, %v2170_v14  ;;  %3064 = vmatprep.subr.mxu1 %v3190_v1 }
 0x252   :  { %3065 = vmatpush3.msra.mxu1 %v4026_v59  ;;  %v2172_v22 = vpop.f32.mrf.mxu0 }
 0x253   :  { %v2176_v13 = vmul.f32 0.17677669, %v2172_v22  ;;  %3066 = vmatprep.subr.mxu1 %v3190_v1  ;;  %2177 = vmax.xlane.f32.xlu0 %v2175_v25 }
 0x254   :  { %3067 = vmatpush3.msra.mxu1 %v4038_v6  ;;  %v2004_v6 = vld [vmem:[%s4569_s1 + $0x50] sm:$0xff]  ;;  %s3192_s1 = smov [#allocation2]  }
 0x255   :  { %2334 = vmax.xlane.f32.xlu1 %v2176_v13  ;;  %3071 = vmatprep.subr.mxu1 %v3190_v1  ;;  %s2495_s8 = sshll.u32 %s3192_s1, 4  ;;  %s2496_s8 = int_to_ptr.vmem [resolvable:$true] %s2495_s8 }
 0x256   :  { %3118 = vmatpush3.msra.mxu0 %v2004_v6  ;;  %s3145_s9 = scalar_lea.vmem %s2496_s8, 32  ;;  %p3150_p1 = scmp.lt.s32.totalorder %s2496_s8, %s2496_s8 }
 0x257   :  { %3119 = vmatprep.subr.mxu0 %v3190_v1  ;;  %p3146_p0 = scmp.ne.s32.totalorder %s2496_s8, %s3145_s9  ;;  %p3151_p2 = scmp.lt.s32.totalorder %s3145_s9, %s3145_s9 }
 0x258   :  { %3120 = vmatpush3.msra.mxu0 %v2003_v61 }
 0x259   :  { %3121 = vmatprep.subr.mxu0 %v3190_v1  ;;  %p3152_p3 = por %p3151_p2, %p3150_p1 }
 0x25a   :  { %3122 = vmatpush3.msra.mxu0 %v2002_v18 }
 0x25b   :  { %3123 = vmatprep.subr.mxu0 %v3190_v1  ;;  %p3153_p4 = pnand %p3152_p3, %p3146_p0 }
 0x25c   :  { %3124 = vmatpush3.msra.mxu0 %v2001_v5 }
 0x2dc   :  { %v2178_v33 = vpop.xlane.xlu0 %2177 }
 0x2dd   :  { %v2179_v12 = vsub.f32 %v2175_v25, %v2178_v33 }
 0x2de   :  { %v2335_v29 = vpop.xlane.xlu1 %2334 }
 0x2df   :  { %v2180_v11 = vmul.f32 1.442695, %v2179_v12  ;;  %v2336_v44 = vsub.f32 %v2176_v13, %v2335_v29 }
 0x2e1   :  { %3137 = vpow2.f32 %v2180_v11  ;;  %v2337_v31 = vmul.f32 1.442695, %v2336_v44 }
 0x2e3   :  { %3139 = vpow2.f32 %v2337_v31 }
 0x2ee   :  { %v3138_v40 = vpop.eup %3137 }
 0x2ef   :  { %2182 = vadd.xlane.f32.xlu0 %v3138_v40 }
 0x2f0   :  { %v4496_v59 = vpop.eup %3139 }
 0x2f1   :  { %2339 = vadd.xlane.f32.xlu1 %v4496_v59 }
 0x2f5   :  { %v1994_v46 = vpop.f32.mrf.mxu1 }
 0x2f6   :  { %v1995_v54 = vadd.f32 %v1994_v46, %v1924_v56 }
 0x2f7   :  { %v3035_v53 = vpop.f32.mrf.mxu1 }
 0x2f8   :  { %1999 = vst.msk [vmem:[#allocation2] sm:$0x3] %vm1998_vm0, %v1995_v54 }
 0x378   :  { %v2183_v47 = vpop.xlane.xlu0 %2182 }
 0x379   :  { %3141 = vrcp.f32 %v2183_v47 }
 0x37a   :  { %v2340_v50 = vpop.xlane.xlu1 %2339 }
 0x37b   :  { %3143 = vrcp.f32 %v2340_v50 }
 0x386   :  { %v3142_v28 = vpop.eup %3141 }
 0x387   :  { %v2185_v32 = vmul.f32 %v3142_v28, %v3138_v40 }
 0x389   :  { %3069 = vmatmul.mubr.f32.vlgmr.msra.gmra.mxu1 %v2185_v32 }
 0x38a   :  { %3072 = vmatpush3.msra.mxu1 %v2004_v6  ;;  %3079 = vmatprep.mubr.msk.f32.mxu1 %vm3191_vm15, %v3190_v1 }
 0x38b   :  { %3073 = vmatprep.subr.mxu1 %v3190_v1 }
 0x38c   :  { %3074 = vmatpush3.msra.mxu1 %v2003_v61 }
 0x38d   :  { %3075 = vmatprep.subr.mxu1 %v3190_v1 }
 0x38e   :  { %3076 = vmatpush3.msra.mxu1 %v2002_v18 }
 0x38f   :  { %3077 = vmatprep.subr.mxu1 %v3190_v1 }
 0x390   :  { %3078 = vmatpush3.msra.mxu1 %v2001_v5 }
 0x391   :  { %3082 = vmatprep.subr.mxu1 %v3190_v1 }
 0x449   :  { %v2252_v30 = vpop.f32.mrf.mxu1 }
 0x44a   :  { %3080 = vmatmul.mubr.msk.f32.vlgmr.msra.gmra.mxu1 %vm1801_vm14, %v2252_v30 }
 0x44b   :  { %3083 = vmatpush3.msra.mxu1 %v4323_v52  ;;  %v3070_v41 = vpop.f32.mrf.mxu1  ;;  %3114 = vmatprep.mubr.msk.f32.mxu1 %vm3191_vm15, %v3190_v1 }
 0x44c   :  { %3084 = vmatprep.subr.mxu1 %v3190_v1 }
 0x44d   :  { %3085 = vmatpush3.msra.mxu1 %v4331_v23 }
 0x44e   :  { %3086 = vmatprep.subr.mxu1 %v3190_v1 }
 0x44f   :  { %3087 = vmatpush3.msra.mxu1 %v4307_v26 }
 0x450   :  { %3088 = vmatprep.subr.mxu1 %v3190_v1 }
 0x451   :  { %3089 = vmatpush3.msra.mxu1 %v4315_v3 }
 0x452   :  { %3090 = vmatprep.subr.mxu1 %v3190_v1 }
 0x453   :  { %3091 = vmatpush3.msra.mxu1 %v4289_v38 }
 0x454   :  { %3092 = vmatprep.subr.mxu1 %v3190_v1 }
 0x455   :  { %3093 = vmatpush3.msra.mxu1 %v4298_v39 }
 0x456   :  { %3094 = vmatprep.subr.mxu1 %v3190_v1 }
 0x457   :  { %3095 = vmatpush3.msra.mxu1 %v4271_v60  ;;  %v3144_v60 = vpop.eup %3143 }
 0x458   :  { %3096 = vmatprep.subr.mxu1 %v3190_v1 }
 0x459   :  { %3097 = vmatpush3.msra.mxu1 %v4280_v4 }
 0x45a   :  { %3098 = vmatprep.subr.mxu1 %v3190_v1 }
 0x45b   :  { %3099 = vmatpush3.msra.mxu1 %v4253_v49 }
 0x45c   :  { %3100 = vmatprep.subr.mxu1 %v3190_v1 }
 0x45d   :  { %3101 = vmatpush3.msra.mxu1 %v4262_v20 }
 0x45e   :  { %3102 = vmatprep.subr.mxu1 %v3190_v1 }
 0x45f   :  { %3103 = vmatpush3.msra.mxu1 %v4235_v34  ;;  %v2342_v34 = vmul.f32 %v3144_v60, %v4496_v59 }
 0x460   :  { %3104 = vmatprep.subr.mxu1 %v3190_v1 }
 0x461   :  { %3105 = vmatpush3.msra.mxu1 %v4244_v35  ;;  %v2258_v35 = vsub.s32 2, %v3247_v8 }
 0x462   :  { %3106 = vmatprep.subr.mxu1 %v3190_v1 }
 0x463   :  { %3107 = vmatpush3.msra.mxu1 %v4216_v62  ;;  %v2259_v62 = vrot.slane %v4598_v21, %v2258_v35 }
 0x464   :  { %3108 = vmatprep.subr.mxu1 %v3190_v1 }
 0x465   :  { %3109 = vmatpush3.msra.mxu1 %v4226_v24 }
 0x466   :  { %3110 = vmatprep.subr.mxu1 %v3190_v1 }
 0x467   :  { %3111 = vmatpush3.msra.mxu1 %v4196_v16 }
 0x468   :  { %3112 = vmatprep.subr.mxu1 %v3190_v1 }
 0x469   :  { %3113 = vmatpush3.msra.mxu1 %v4206_v57 }
 0x46a   :  { %3115 = vmatmul.mubr.f32.vlgmr.msra.gmra.mxu1 %v2342_v34 }
 0x50a   :  { %v2329_v49 = vpop.f32.mrf.mxu1 }
 0x50b   :  { %v2330_v20 = vadd.f32 %v2329_v49, %v2259_v62 }
 0x50c   :  { %v3081_v4 = vpop.f32.mrf.mxu1 }
 0x50d   :  { %2333 = vst.msk [vmem:[#allocation4] sm:$0xff] %vm1801_vm14, %v2330_v20 }
 0x52a   :  { %v2409_v24 = vpop.f32.mrf.mxu1 }
 0x52b   :  { %3126 = vmatmul.mubr.msk.f32.vlgmr.msra.gmra.mxu0 %vm1801_vm14, %v2409_v24 }
 0x52c   :  { %v3116_v16 = vpop.f32.mrf.mxu1 }
 0x52d   :  { %3156 = shalt.err (!%p3153_p4)
}
 0x52e   :  { %2498 = dma.vmem_to_hbm [thread:$0]  %s2496_s8, 32, %s4571_s3, [#allocation3]  }
 0x52f   :  { %s3193_s12 = smov [#allocation4]  }
 0x530   :  { %s2504_s13 = sshll.u32 %s3193_s12, 4  ;;  %s2505_s13 = int_to_ptr.vmem [resolvable:$true] %s2504_s13 }
 0x531   :  { %s3165_s14 = scalar_lea.vmem %s2505_s13, 256  ;;  %p3170_p6 = scmp.lt.s32.totalorder %s2505_s13, %s2505_s13 }
 0x532   :  { %p3166_p5 = scmp.ne.s32.totalorder %s2505_s13, %s3165_s14  ;;  %p3171_p7 = scmp.lt.s32.totalorder %s3165_s14, %s3165_s14 }
 0x534   :  { %p3172_p8 = por %p3171_p7, %p3170_p6 }
 0x536   :  { %p3173_p9 = pnand %p3172_p8, %p3166_p5 }
 0x5eb   :  { %v2482_v8 = vpop.f32.mrf.mxu0 }
 0x5ec   :  { %v2483_v57 = vadd.f32 %v2482_v8, %v2259_v62 }
 0x5ed   :  { %v3127_v38 = vpop.f32.mrf.mxu0 }
 0x5ee   :  { %2486 = vst.msk [vmem:[#allocation4 + $0x8] sm:$0xff] %vm1801_vm14, %v2483_v57 }
 0x5ef   :  { %3176 = shalt.err (!%p3173_p9)
}
 0x5f0   :  { %s3194_s15 = smov 128   ;;  %s3195_s16 = smov 8  }
 0x5f1   :  { %2510 = dma.vmem_to_hbm [thread:$0]  %s2505_s13, 256, %s4572_s4, [#allocation5], %s3194_s15, %s3194_s15, %s3195_s16  }
 0x5f2   :  { %3185 = dma.done.wait [#allocation3], 32  }
 0x5f3   :  { %3186 = vsyncadd [#allocation3], 4294967264 }
 0x5f4   :  { %3187 = dma.done.wait [#allocation5], 256  }
 0x5f5   :  { %3188 = vsyncadd [#allocation5], 4294967040 }
 0x5f6   :  { %2519 = vsyncpa [#allocation3], 1 }
 0x5f7   :  { %2520 = vsyncpa [#allocation5], 1 }

</bundles_post_ra>
